<compile_context>
chip_gen: v7x
topology: tpu7x:2x2x1
jax: 0.10.0
libtpu: 0.0.40
codegen_flags: <defaults>
</compile_context>

<pallas_src>
import functools
import math

import numpy as np
import jax
import jax.numpy as jnp
from jax.experimental import pallas as pl
from jax.experimental.pallas import tpu as pltpu

# ---- small, module-consistent sizes -------------------------------------------------
T, NE, A, S = 4, 2, 4, 16        # num_steps, num_envs, num_agents (= max_agents), state_size
E = 32                           # state_encoder output_size == RSA embed_size
HEADS = 2
DH = E // HEADS
H = 32                           # LSTM hidden == LSTM output_size
VH = 32                          # value-head hidden size
F32 = jnp.float32


# =========================== fused per-time-step kernel ================================
def _fused_kernel(x_ref, mask_ref, pe_ref, amask_ref,
                  encw_ref, encb_ref,
                  wqkv_ref, bqkv_ref, wo_ref, bo_ref,
                  wlstm_ref, blstm_ref, h0_ref, c0_ref,
                  v1w_ref, v1b_ref, v2w_ref, v2b_ref,
                  vals_ref, hn_ref, cn_ref,
                  h_sc, c_sc,
                  *, heads, dh, embed, hidden, num_envs, num_agents):
    t = pl.program_id(0)

    # ---- init the recurrent state once -------------------------------------------------
    @pl.when(t == 0)
    def _():
        h_sc[...] = h0_ref[...]
        c_sc[...] = c0_ref[...]

    # ---- StatesEncoder: Linear + LeakyReLU ---------------------------------------------
    x = x_ref[0]                                                         # (B2, S)
    enc = jax.nn.leaky_relu(
        jnp.dot(x, encw_ref[...], preferred_element_type=jnp.float32) + encb_ref[...])

    # ---- PositionalEncoding + RSA (residual self-attention) ----------------------------
    xp = enc + pe_ref[...]                                               # (B2, E)
    # Fused QKV projection: one (B2, E) x (E, 3E) matmul instead of three.
    qkv = jnp.dot(xp, wqkv_ref[...], preferred_element_type=jnp.float32) + bqkv_ref[...]
    scale = 1.0 / math.sqrt(dh)

    # residual + out-projection bias; per-head out-projection is accumulated (no lane concat)
    out = xp + bo_ref[...]                                               # (B2, E)
    for hh in range(heads):                                              # static unroll, heads=2
        qh = qkv[:, hh * dh:(hh + 1) * dh]
        kh = qkv[:, embed + hh * dh:embed + (hh + 1) * dh]
        vh = qkv[:, 2 * embed + hh * dh:2 * embed + (hh + 1) * dh]
        # flat (B2, B2) scores; block-diagonal mask keeps attention within each env
        s = jax.lax.dot_general(qh, kh, (((1,), (1,)), ((), ())),
                                preferred_element_type=jnp.float32) * scale
        s = s + amask_ref[...]
        s = s - jnp.max(s, axis=-1, keepdims=True)
        p = jnp.exp(s)
        p = p / jnp.sum(p, axis=-1, keepdims=True)
        oh = jnp.dot(p, vh, preferred_element_type=jnp.float32)          # (B2, DH)
        # concat(heads) @ Wo  ==  sum_h head_h @ Wo[h_rows, :]
        out = out + jnp.dot(oh, wo_ref[hh * dh:(hh + 1) * dh, :],
                            preferred_element_type=jnp.float32)

    # ---- LSTM step with done-masked (pre-step) reset ------------------------------------
    mask = mask_ref[0]                                                   # (B2, H), = 1 - done
    h = h_sc[...] * mask
    c = c_sc[...] * mask
    xh = jnp.concatenate([out, h], axis=-1)                              # (B2, E+H)
    gates = (jnp.dot(xh, wlstm_ref[...], preferred_element_type=jnp.float32)
             + blstm_ref[...])                                           # (B2, 4H), torch i,f,g,o
    i_g = jax.nn.sigmoid(gates[:, 0 * hidden:1 * hidden])
    f_g = jax.nn.sigmoid(gates[:, 1 * hidden:2 * hidden])
    g_g = jnp.tanh(gates[:, 2 * hidden:3 * hidden])
    o_g = jax.nn.sigmoid(gates[:, 3 * hidden:4 * hidden])
    c_new = f_g * c + i_g * g_g
    h_new = o_g * jnp.tanh(c_new)
    h_sc[...] = h_new
    c_sc[...] = c_new

    # resident final-state outputs: only the last step writes them
    @pl.when(t == pl.num_programs(0) - 1)
    def _():
        hn_ref[...] = h_new
        cn_ref[...] = c_new

    # ---- max over agents + ValueNetwork head --------------------------------------------
    env_max = [jnp.max(h_new[e * num_agents:(e + 1) * num_agents, :],
                       axis=0, keepdims=True) for e in range(num_envs)]
    m = jnp.concatenate(env_max, axis=0) if num_envs > 1 else env_max[0]  # (NE, H)
    h1 = jax.nn.leaky_relu(
        jnp.dot(m, v1w_ref[...], preferred_element_type=jnp.float32) + v1b_ref[...])
    vals_ref[0] = (jnp.dot(h1, v2w_ref[...], preferred_element_type=jnp.float32)
                   + v2b_ref[...])                                        # (NE, 1)


# ================================ plain-JAX glue ========================================
def positional_encoding(max_len, dim):
    pe = np.zeros((max_len, dim), dtype=np.float32)
    pos = np.arange(max_len, dtype=np.float32)[:, None]
    div = np.exp(np.arange(0, dim, 2, dtype=np.float32) * (-math.log(10000.0) / dim))
    pe[:, 0::2] = np.sin(pos * div)
    pe[:, 1::2] = np.cos(pos * div)
    return jnp.asarray(pe)


def init_params(key):
    ks = jax.random.split(key, 16)
    w = lambda k, shape: (0.1 * jax.random.normal(k, shape)).astype(F32)
    return dict(
        enc_w=w(ks[0], (S, E)), enc_b=w(ks[1], (1, E)),
        wqkv=w(ks[2], (E, 3 * E)), bqkv=w(ks[3], (1, 3 * E)),   # fused Wq|Wk|Wv
        wo=w(ks[4], (E, E)), bo=w(ks[5], (1, E)),
        lstm_w=w(ks[6], (E + H, 4 * H)),                        # fused [Wih; Whh]
        lstm_b=w(ks[7], (1, 4 * H)) + w(ks[8], (1, 4 * H)),     # b_ih + b_hh
        v1_w=w(ks[9], (H, VH)), v1_b=w(ks[10], (1, VH)),
        v2_w=w(ks[11], (VH, 1)), v2_b=w(ks[12], (1, 1)),
    )


def shared_critic_lstm_values(x, terminals, params, memory_state=None):
    """Mirrors SharedCriticLSTM.values / .forward with a single fused Pallas kernel."""
    t, ne, a, s = x.shape
    b2 = ne * a
    x2 = x.reshape(t, b2, s).astype(F32)

    # reset mask precomputed in glue, broadcast to lane width H
    dones = jnp.repeat(terminals.astype(F32), a, axis=2).reshape(t, b2)
    mask3 = jnp.broadcast_to((1.0 - dones)[:, :, None], (t, b2, H)).astype(F32)

    # positional encoding tiled to the flattened (env-major, agent-minor) row order
    pe_t = jnp.tile(positional_encoding(a, E), (ne, 1))                   # (b2, E)

    # block-diagonal additive mask: attention only within each env's agent group
    env_ids = jnp.arange(b2) // a
    amask = jnp.where(env_ids[:, None] == env_ids[None, :], 0.0, -1e30).astype(F32)

    if memory_state is None:
        h0 = jnp.zeros((b2, H), F32)
        c0 = jnp.zeros((b2, H), F32)
    else:
        h0, c0 = memory_state

    kernel = functools.partial(_fused_kernel, heads=HEADS, dh=DH, embed=E,
                               hidden=H, num_envs=ne, num_agents=a)
    full = lambda shape: pl.BlockSpec(shape, lambda i, _n=len(shape): (0,) * _n)

    vals, hn, cn = pl.pallas_call(
        kernel,
        out_shape=(jax.ShapeDtypeStruct((t, ne, 1), F32),
                   jax.ShapeDtypeStruct((b2, H), F32),
                   jax.ShapeDtypeStruct((b2, H), F32)),
        grid=(t,),
        in_specs=[pl.BlockSpec((1, b2, s), lambda i: (i, 0, 0)),    # x[t]
                  pl.BlockSpec((1, b2, H), lambda i: (i, 0, 0)),    # reset mask[t]
                  full((b2, E)),                                    # PE (tiled)
                  full((b2, b2)),                                   # block-diag attn mask
                  full((s, E)), full((1, E)),                       # encoder
                  full((E, 3 * E)), full((1, 3 * E)),               # fused QKV
                  full((E, E)), full((1, E)),                       # out-proj
                  full((E + H, 4 * H)), full((1, 4 * H)),           # fused LSTM weights
                  full((b2, H)), full((b2, H)),                     # h0, c0
                  full((H, VH)), full((1, VH)),                     # value head L1
                  full((VH, 1)), full((1, 1))],                     # value head L2
        out_specs=(pl.BlockSpec((1, ne, 1), lambda i: (i, 0, 0)),   # values[t]
                   full((b2, H)), full((b2, H))),                   # hn, cn (resident)
        scratch_shapes=[pltpu.VMEM((b2, H), F32), pltpu.VMEM((b2, H), F32)],
        compiler_params=pltpu.CompilerParams(dimension_semantics=("arbitrary",)),
    )(x2, mask3, pe_t, amask,
      params["enc_w"], params["enc_b"],
      params["wqkv"], params["bqkv"], params["wo"], params["bo"],
      params["lstm_w"], params["lstm_b"],
      h0, c0,
      params["v1_w"], params["v1_b"], params["v2_w"], params["v2_b"])

    return vals, (hn, cn)


if __name__ == "__main__":
    key = jax.random.PRNGKey(0)
    kx, kt, kp = jax.random.split(key, 3)
    x = jax.random.normal(kx, (T, NE, A, S), dtype=F32)
    terminals = (jax.random.uniform(kt, (T, NE, 1)) < 0.2).astype(F32)
    params = init_params(kp)

    values, (hn, cn) = shared_critic_lstm_values(x, terminals, params)
    jax.block_until_ready(values)
    jax.block_until_ready(hn)
    jax.block_until_ready(cn)

    assert values.shape == (T, NE, 1)
    assert hn.shape == (NE * A, H) and cn.shape == (NE * A, H)
    assert bool(jnp.all(jnp.isfinite(values)))
    assert bool(jnp.all(jnp.isfinite(hn))) and bool(jnp.all(jnp.isfinite(cn)))
    print("KERNEL_OK")
</pallas_src>

<mosaic_0001>
module attributes {stable_mosaic.version = 11 : i64} {
  func.func @_fused_kernel(%arg0: i32, %arg1: memref<1x8x16xf32, #tpu.memory_space<vmem>>, %arg2: memref<1x8x32xf32, #tpu.memory_space<vmem>>, %arg3: memref<8x32xf32, #tpu.memory_space<vmem>>, %arg4: memref<8x8xf32, #tpu.memory_space<vmem>>, %arg5: memref<16x32xf32, #tpu.memory_space<vmem>>, %arg6: memref<1x32xf32, #tpu.memory_space<vmem>>, %arg7: memref<32x96xf32, #tpu.memory_space<vmem>>, %arg8: memref<1x96xf32, #tpu.memory_space<vmem>>, %arg9: memref<32x32xf32, #tpu.memory_space<vmem>>, %arg10: memref<1x32xf32, #tpu.memory_space<vmem>>, %arg11: memref<64x128xf32, #tpu.memory_space<vmem>>, %arg12: memref<1x128xf32, #tpu.memory_space<vmem>>, %arg13: memref<8x32xf32, #tpu.memory_space<vmem>>, %arg14: memref<8x32xf32, #tpu.memory_space<vmem>>, %arg15: memref<32x32xf32, #tpu.memory_space<vmem>>, %arg16: memref<1x32xf32, #tpu.memory_space<vmem>>, %arg17: memref<32x1xf32, #tpu.memory_space<vmem>>, %arg18: memref<1x1xf32, #tpu.memory_space<vmem>>, %arg19: memref<1x2x1xf32, #tpu.memory_space<vmem>>, %arg20: memref<8x32xf32, #tpu.memory_space<vmem>>, %arg21: memref<8x32xf32, #tpu.memory_space<vmem>>, %arg22: memref<8x32xf32, #tpu.memory_space<vmem>>, %arg23: memref<8x32xf32, #tpu.memory_space<vmem>>) attributes {dimension_semantics = [#tpu.dimension_semantics<arbitrary>], iteration_bounds = array<i64: 4>, scalar_prefetch = 0 : i64, scratch_operands = 2 : i64, tpu.core_type = #tpu.core_type<tc>, window_params = [{transform_indices = @transform_0, window_bounds = array<i64: 1, 8, 16>}, {transform_indices = @transform_1, window_bounds = array<i64: 1, 8, 32>}, {pipeline_mode = #tpu.pipeline_mode<synchronous>, transform_indices = @transform_2, window_bounds = array<i64: 8, 32>}, {pipeline_mode = #tpu.pipeline_mode<synchronous>, transform_indices = @transform_3, window_bounds = array<i64: 8, 8>}, {pipeline_mode = #tpu.pipeline_mode<synchronous>, transform_indices = @transform_4, window_bounds = array<i64: 16, 32>}, {pipeline_mode = #tpu.pipeline_mode<synchronous>, transform_indices = @transform_5, window_bounds = array<i64: 1, 32>}, {pipeline_mode = #tpu.pipeline_mode<synchronous>, transform_indices = @transform_6, window_bounds = array<i64: 32, 96>}, {pipeline_mode = #tpu.pipeline_mode<synchronous>, transform_indices = @transform_7, window_bounds = array<i64: 1, 96>}, {pipeline_mode = #tpu.pipeline_mode<synchronous>, transform_indices = @transform_8, window_bounds = array<i64: 32, 32>}, {pipeline_mode = #tpu.pipeline_mode<synchronous>, transform_indices = @transform_9, window_bounds = array<i64: 1, 32>}, {pipeline_mode = #tpu.pipeline_mode<synchronous>, transform_indices = @transform_10, window_bounds = array<i64: 64, 128>}, {pipeline_mode = #tpu.pipeline_mode<synchronous>, transform_indices = @transform_11, window_bounds = array<i64: 1, 128>}, {pipeline_mode = #tpu.pipeline_mode<synchronous>, transform_indices = @transform_12, window_bounds = array<i64: 8, 32>}, {pipeline_mode = #tpu.pipeline_mode<synchronous>, transform_indices = @transform_13, window_bounds = array<i64: 8, 32>}, {pipeline_mode = #tpu.pipeline_mode<synchronous>, transform_indices = @transform_14, window_bounds = array<i64: 32, 32>}, {pipeline_mode = #tpu.pipeline_mode<synchronous>, transform_indices = @transform_15, window_bounds = array<i64: 1, 32>}, {pipeline_mode = #tpu.pipeline_mode<synchronous>, transform_indices = @transform_16, window_bounds = array<i64: 32, 1>}, {pipeline_mode = #tpu.pipeline_mode<synchronous>, transform_indices = @transform_17, window_bounds = array<i64: 1, 1>}, {transform_indices = @transform_18, window_bounds = array<i64: 1, 2, 1>}, {pipeline_mode = #tpu.pipeline_mode<synchronous>, transform_indices = @transform_19, window_bounds = array<i64: 8, 32>}, {pipeline_mode = #tpu.pipeline_mode<synchronous>, transform_indices = @transform_20, window_bounds = array<i64: 8, 32>}]} {
    %c0_i32 = arith.constant 0 : i32
    %0 = arith.cmpi eq, %arg0, %c0_i32 : i32
    %1 = arith.extui %0 : i1 to i32
    %c0_i32_0 = arith.constant 0 : i32
    %2 = arith.cmpi ne, %1, %c0_i32_0 : i32
    scf.if %2 {
      %c0_74 = arith.constant 0 : index
      %c0_75 = arith.constant 0 : index
      %134 = vector.load %arg13[%c0_74, %c0_75] : memref<8x32xf32, #tpu.memory_space<vmem>>, vector<8x32xf32>
      %c0_76 = arith.constant 0 : index
      %c0_77 = arith.constant 0 : index
      %135 = vector.load %arg22[%c0_76, %c0_77] : memref<8x32xf32, #tpu.memory_space<vmem>>, vector<8x32xf32>
      tpu.vector_store %arg22[%c0_76, %c0_77], %134 {strides = array<i32>} : memref<8x32xf32, #tpu.memory_space<vmem>>, vector<8x32xf32>,
      %c0_78 = arith.constant 0 : index
      %c0_79 = arith.constant 0 : index
      %136 = vector.load %arg14[%c0_78, %c0_79] : memref<8x32xf32, #tpu.memory_space<vmem>>, vector<8x32xf32>
      %c0_80 = arith.constant 0 : index
      %c0_81 = arith.constant 0 : index
      %137 = vector.load %arg23[%c0_80, %c0_81] : memref<8x32xf32, #tpu.memory_space<vmem>>, vector<8x32xf32>
      tpu.vector_store %arg23[%c0_80, %c0_81], %136 {strides = array<i32>} : memref<8x32xf32, #tpu.memory_space<vmem>>, vector<8x32xf32>,
    } else {
    }
    %c0 = arith.constant 0 : index
    %c0_1 = arith.constant 0 : index
    %c0_2 = arith.constant 0 : index
    %3 = vector.load %arg1[%c0, %c0_1, %c0_2] : memref<1x8x16xf32, #tpu.memory_space<vmem>>, vector<1x8x16xf32>
    %4 = vector.shape_cast %3 : vector<1x8x16xf32> to vector<8x16xf32>
    %c0_3 = arith.constant 0 : index
    %c0_4 = arith.constant 0 : index
    %5 = vector.load %arg5[%c0_3, %c0_4] : memref<16x32xf32, #tpu.memory_space<vmem>>, vector<16x32xf32>
    %cst = arith.constant dense<0.000000e+00> : vector<8x32xf32>
    %6 = tpu.matmul %4, %5, %cst {dimension_numbers = #tpu.dot_dimension_numbers<[1], [0], [0], [1], [0, 0, 1, 1], [], []>} : vector<8x16xf32>, vector<16x32xf32>, vector<8x32xf32> -> vector<8x32xf32>
    %c0_5 = arith.constant 0 : index
    %c0_6 = arith.constant 0 : index
    %7 = vector.load %arg6[%c0_5, %c0_6] : memref<1x32xf32, #tpu.memory_space<vmem>>, vector<1x32xf32>
    %8 = vector.broadcast %7 : vector<1x32xf32> to vector<8x32xf32>
    %9 = arith.addf %6, %8 : vector<8x32xf32>
    %cst_7 = arith.constant 0.000000e+00 : f32
    %10 = vector.broadcast %cst_7 : f32 to vector<8x32xf32>
    %11 = arith.cmpf oge, %9, %10 : vector<8x32xf32>
    %cst_8 = arith.constant 0.00999999977 : f32
    %12 = vector.broadcast %cst_8 : f32 to vector<8x32xf32>
    %13 = arith.mulf %12, %9 : vector<8x32xf32>
    %14 = arith.select %11, %9, %13 : vector<8x32xi1>, vector<8x32xf32>
    %c0_9 = arith.constant 0 : index
    %c0_10 = arith.constant 0 : index
    %15 = vector.load %arg3[%c0_9, %c0_10] : memref<8x32xf32, #tpu.memory_space<vmem>>, vector<8x32xf32>
    %16 = arith.addf %14, %15 : vector<8x32xf32>
    %c0_11 = arith.constant 0 : index
    %c0_12 = arith.constant 0 : index
    %17 = vector.load %arg7[%c0_11, %c0_12] : memref<32x96xf32, #tpu.memory_space<vmem>>, vector<32x96xf32>
    %cst_13 = arith.constant dense<0.000000e+00> : vector<8x96xf32>
    %18 = tpu.matmul %16, %17, %cst_13 {dimension_numbers = #tpu.dot_dimension_numbers<[1], [0], [0], [1], [0, 0, 1, 1], [], []>} : vector<8x32xf32>, vector<32x96xf32>, vector<8x96xf32> -> vector<8x96xf32>
    %c0_14 = arith.constant 0 : index
    %c0_15 = arith.constant 0 : index
    %19 = vector.load %arg8[%c0_14, %c0_15] : memref<1x96xf32, #tpu.memory_space<vmem>>, vector<1x96xf32>
    %20 = vector.broadcast %19 : vector<1x96xf32> to vector<8x96xf32>
    %21 = arith.addf %18, %20 : vector<8x96xf32>
    %c0_16 = arith.constant 0 : index
    %c0_17 = arith.constant 0 : index
    %22 = vector.load %arg10[%c0_16, %c0_17] : memref<1x32xf32, #tpu.memory_space<vmem>>, vector<1x32xf32>
    %23 = vector.broadcast %22 : vector<1x32xf32> to vector<8x32xf32>
    %24 = arith.addf %16, %23 : vector<8x32xf32>
    %25 = vector.extract_strided_slice %21 {offsets = [0, 0], sizes = [8, 16], strides = [1, 1]} : vector<8x96xf32> to vector<8x16xf32>
    %26 = vector.extract_strided_slice %21 {offsets = [0, 32], sizes = [8, 16], strides = [1, 1]} : vector<8x96xf32> to vector<8x16xf32>
    %27 = vector.extract_strided_slice %21 {offsets = [0, 64], sizes = [8, 16], strides = [1, 1]} : vector<8x96xf32> to vector<8x16xf32>
    %cst_18 = arith.constant dense<0.000000e+00> : vector<8x8xf32>
    %28 = tpu.matmul %25, %26, %cst_18 {dimension_numbers = #tpu.dot_dimension_numbers<[1], [1], [0], [0], [0, 0, 1, 0], [], []>} : vector<8x16xf32>, vector<8x16xf32>, vector<8x8xf32> -> vector<8x8xf32>
    %cst_19 = arith.constant 2.500000e-01 : f32
    %29 = vector.broadcast %cst_19 : f32 to vector<8x8xf32>
    %30 = arith.mulf %28, %29 : vector<8x8xf32>
    %c0_20 = arith.constant 0 : index
    %c0_21 = arith.constant 0 : index
    %31 = vector.load %arg4[%c0_20, %c0_21] : memref<8x8xf32, #tpu.memory_space<vmem>>, vector<8x8xf32>
    %32 = arith.addf %30, %31 : vector<8x8xf32>
    %cst_22 = arith.constant dense<0xFF800000> : vector<8xf32>
    %33 = vector.multi_reduction <maximumf>, %32, %cst_22 [1] : vector<8x8xf32> to vector<8xf32>
    %34 = vector.shape_cast %33 : vector<8xf32> to vector<8x1xf32>
    %35 = vector.broadcast %34 : vector<8x1xf32> to vector<8x8xf32>
    %36 = arith.subf %32, %35 : vector<8x8xf32>
    %37 = math.exp %36 : vector<8x8xf32>
    %cst_23 = arith.constant dense<0.000000e+00> : vector<8xf32>
    %38 = vector.multi_reduction <add>, %37, %cst_23 [1] : vector<8x8xf32> to vector<8xf32>
    %39 = vector.shape_cast %38 : vector<8xf32> to vector<8x1xf32>
    %40 = vector.broadcast %39 : vector<8x1xf32> to vector<8x8xf32>
    %41 = arith.divf %37, %40 : vector<8x8xf32>
    %cst_24 = arith.constant dense<0.000000e+00> : vector<8x16xf32>
    %42 = tpu.matmul %41, %27, %cst_24 {dimension_numbers = #tpu.dot_dimension_numbers<[1], [0], [0], [1], [0, 0, 1, 1], [], []>} : vector<8x8xf32>, vector<8x16xf32>, vector<8x16xf32> -> vector<8x16xf32>
    %c0_25 = arith.constant 0 : index
    %c0_26 = arith.constant 0 : index
    %43 = vector.load %arg9[%c0_25, %c0_26] : memref<32x32xf32, #tpu.memory_space<vmem>>, vector<16x32xf32>
    %cst_27 = arith.constant dense<0.000000e+00> : vector<8x32xf32>
    %44 = tpu.matmul %42, %43, %cst_27 {dimension_numbers = #tpu.dot_dimension_numbers<[1], [0], [0], [1], [0, 0, 1, 1], [], []>} : vector<8x16xf32>, vector<16x32xf32>, vector<8x32xf32> -> vector<8x32xf32>
    %45 = arith.addf %24, %44 : vector<8x32xf32>
    %46 = vector.extract_strided_slice %21 {offsets = [0, 16], sizes = [8, 16], strides = [1, 1]} : vector<8x96xf32> to vector<8x16xf32>
    %47 = vector.extract_strided_slice %21 {offsets = [0, 48], sizes = [8, 16], strides = [1, 1]} : vector<8x96xf32> to vector<8x16xf32>
    %48 = vector.extract_strided_slice %21 {offsets = [0, 80], sizes = [8, 16], strides = [1, 1]} : vector<8x96xf32> to vector<8x16xf32>
    %cst_28 = arith.constant dense<0.000000e+00> : vector<8x8xf32>
    %49 = tpu.matmul %46, %47, %cst_28 {dimension_numbers = #tpu.dot_dimension_numbers<[1], [1], [0], [0], [0, 0, 1, 0], [], []>} : vector<8x16xf32>, vector<8x16xf32>, vector<8x8xf32> -> vector<8x8xf32>
    %cst_29 = arith.constant 2.500000e-01 : f32
    %50 = vector.broadcast %cst_29 : f32 to vector<8x8xf32>
    %51 = arith.mulf %49, %50 : vector<8x8xf32>
    %c0_30 = arith.constant 0 : index
    %c0_31 = arith.constant 0 : index
    %52 = vector.load %arg4[%c0_30, %c0_31] : memref<8x8xf32, #tpu.memory_space<vmem>>, vector<8x8xf32>
    %53 = arith.addf %51, %52 : vector<8x8xf32>
    %cst_32 = arith.constant dense<0xFF800000> : vector<8xf32>
    %54 = vector.multi_reduction <maximumf>, %53, %cst_32 [1] : vector<8x8xf32> to vector<8xf32>
    %55 = vector.shape_cast %54 : vector<8xf32> to vector<8x1xf32>
    %56 = vector.broadcast %55 : vector<8x1xf32> to vector<8x8xf32>
    %57 = arith.subf %53, %56 : vector<8x8xf32>
    %58 = math.exp %57 : vector<8x8xf32>
    %cst_33 = arith.constant dense<0.000000e+00> : vector<8xf32>
    %59 = vector.multi_reduction <add>, %58, %cst_33 [1] : vector<8x8xf32> to vector<8xf32>
    %60 = vector.shape_cast %59 : vector<8xf32> to vector<8x1xf32>
    %61 = vector.broadcast %60 : vector<8x1xf32> to vector<8x8xf32>
    %62 = arith.divf %58, %61 : vector<8x8xf32>
    %cst_34 = arith.constant dense<0.000000e+00> : vector<8x16xf32>
    %63 = tpu.matmul %62, %48, %cst_34 {dimension_numbers = #tpu.dot_dimension_numbers<[1], [0], [0], [1], [0, 0, 1, 1], [], []>} : vector<8x8xf32>, vector<8x16xf32>, vector<8x16xf32> -> vector<8x16xf32>
    %c16 = arith.constant 16 : index
    %c0_35 = arith.constant 0 : index
    %64 = vector.load %arg9[%c16, %c0_35] : memref<32x32xf32, #tpu.memory_space<vmem>>, vector<16x32xf32>
    %cst_36 = arith.constant dense<0.000000e+00> : vector<8x32xf32>
    %65 = tpu.matmul %63, %64, %cst_36 {dimension_numbers = #tpu.dot_dimension_numbers<[1], [0], [0], [1], [0, 0, 1, 1], [], []>} : vector<8x16xf32>, vector<16x32xf32>, vector<8x32xf32> -> vector<8x32xf32>
    %66 = arith.addf %45, %65 : vector<8x32xf32>
    %c0_37 = arith.constant 0 : index
    %c0_38 = arith.constant 0 : index
    %c0_39 = arith.constant 0 : index
    %67 = vector.load %arg2[%c0_37, %c0_38, %c0_39] : memref<1x8x32xf32, #tpu.memory_space<vmem>>, vector<1x8x32xf32>
    %68 = vector.shape_cast %67 : vector<1x8x32xf32> to vector<8x32xf32>
    %c0_40 = arith.constant 0 : index
    %c0_41 = arith.constant 0 : index
    %69 = vector.load %arg22[%c0_40, %c0_41] : memref<8x32xf32, #tpu.memory_space<vmem>>, vector<8x32xf32>
    %70 = arith.mulf %69, %68 : vector<8x32xf32>
    %c0_42 = arith.constant 0 : index
    %c0_43 = arith.constant 0 : index
    %71 = vector.load %arg23[%c0_42, %c0_43] : memref<8x32xf32, #tpu.memory_space<vmem>>, vector<8x32xf32>
    %72 = arith.mulf %71, %68 : vector<8x32xf32>
    %73 = tpu.concatenate %66, %70 in 1 : vector<8x32xf32>, vector<8x32xf32> -> vector<8x64xf32>
    %c0_44 = arith.constant 0 : index
    %c0_45 = arith.constant 0 : index
    %74 = vector.load %arg11[%c0_44, %c0_45] : memref<64x128xf32, #tpu.memory_space<vmem>>, vector<64x128xf32>
    %cst_46 = arith.constant dense<0.000000e+00> : vector<8x128xf32>
    %75 = tpu.matmul %73, %74, %cst_46 {dimension_numbers = #tpu.dot_dimension_numbers<[1], [0], [0], [1], [0, 0, 1, 1], [], []>} : vector<8x64xf32>, vector<64x128xf32>, vector<8x128xf32> -> vector<8x128xf32>
    %c0_47 = arith.constant 0 : index
    %c0_48 = arith.constant 0 : index
    %76 = vector.load %arg12[%c0_47, %c0_48] : memref<1x128xf32, #tpu.memory_space<vmem>>, vector<1x128xf32>
    %77 = vector.broadcast %76 : vector<1x128xf32> to vector<8x128xf32>
    %78 = arith.addf %75, %77 : vector<8x128xf32>
    %79 = vector.extract_strided_slice %78 {offsets = [0, 0], sizes = [8, 32], strides = [1, 1]} : vector<8x128xf32> to vector<8x32xf32>
    %80 = arith.negf %79 : vector<8x32xf32>
    %81 = math.exp %80 : vector<8x32xf32>
    %cst_49 = arith.constant 1.000000e+00 : f32
    %82 = vector.broadcast %cst_49 : f32 to vector<8x32xf32>
    %83 = arith.addf %82, %81 : vector<8x32xf32>
    %84 = arith.divf %82, %83 : vector<8x32xf32>
    %85 = vector.extract_strided_slice %78 {offsets = [0, 32], sizes = [8, 32], strides = [1, 1]} : vector<8x128xf32> to vector<8x32xf32>
    %86 = arith.negf %85 : vector<8x32xf32>
    %87 = math.exp %86 : vector<8x32xf32>
    %cst_50 = arith.constant 1.000000e+00 : f32
    %88 = vector.broadcast %cst_50 : f32 to vector<8x32xf32>
    %89 = arith.addf %88, %87 : vector<8x32xf32>
    %90 = arith.divf %88, %89 : vector<8x32xf32>
    %91 = vector.extract_strided_slice %78 {offsets = [0, 64], sizes = [8, 32], strides = [1, 1]} : vector<8x128xf32> to vector<8x32xf32>
    %92 = math.tanh %91 : vector<8x32xf32>
    %93 = vector.extract_strided_slice %78 {offsets = [0, 96], sizes = [8, 32], strides = [1, 1]} : vector<8x128xf32> to vector<8x32xf32>
    %94 = arith.negf %93 : vector<8x32xf32>
    %95 = math.exp %94 : vector<8x32xf32>
    %cst_51 = arith.constant 1.000000e+00 : f32
    %96 = vector.broadcast %cst_51 : f32 to vector<8x32xf32>
    %97 = arith.addf %96, %95 : vector<8x32xf32>
    %98 = arith.divf %96, %97 : vector<8x32xf32>
    %99 = arith.mulf %90, %72 : vector<8x32xf32>
    %100 = arith.mulf %84, %92 : vector<8x32xf32>
    %101 = arith.addf %99, %100 : vector<8x32xf32>
    %102 = math.tanh %101 : vector<8x32xf32>
    %103 = arith.mulf %98, %102 : vector<8x32xf32>
    %c0_52 = arith.constant 0 : index
    %c0_53 = arith.constant 0 : index
    %104 = vector.load %arg22[%c0_52, %c0_53] : memref<8x32xf32, #tpu.memory_space<vmem>>, vector<8x32xf32>
    tpu.vector_store %arg22[%c0_52, %c0_53], %103 {strides = array<i32>} : memref<8x32xf32, #tpu.memory_space<vmem>>, vector<8x32xf32>,
    %c0_54 = arith.constant 0 : index
    %c0_55 = arith.constant 0 : index
    %105 = vector.load %arg23[%c0_54, %c0_55] : memref<8x32xf32, #tpu.memory_space<vmem>>, vector<8x32xf32>
    tpu.vector_store %arg23[%c0_54, %c0_55], %101 {strides = array<i32>} : memref<8x32xf32, #tpu.memory_space<vmem>>, vector<8x32xf32>,
    %c3_i32 = arith.constant 3 : i32
    %106 = arith.cmpi eq, %arg0, %c3_i32 : i32
    %107 = arith.extui %106 : i1 to i32
    %c0_i32_56 = arith.constant 0 : i32
    %108 = arith.cmpi ne, %107, %c0_i32_56 : i32
    scf.if %108 {
      %c0_74 = arith.constant 0 : index
      %c0_75 = arith.constant 0 : index
      %134 = vector.load %arg20[%c0_74, %c0_75] : memref<8x32xf32, #tpu.memory_space<vmem>>, vector<8x32xf32>
      tpu.vector_store %arg20[%c0_74, %c0_75], %103 {strides = array<i32>} : memref<8x32xf32, #tpu.memory_space<vmem>>, vector<8x32xf32>,
      %c0_76 = arith.constant 0 : index
      %c0_77 = arith.constant 0 : index
      %135 = vector.load %arg21[%c0_76, %c0_77] : memref<8x32xf32, #tpu.memory_space<vmem>>, vector<8x32xf32>
      tpu.vector_store %arg21[%c0_76, %c0_77], %101 {strides = array<i32>} : memref<8x32xf32, #tpu.memory_space<vmem>>, vector<8x32xf32>,
    } else {
    }
    %109 = vector.extract_strided_slice %103 {offsets = [0, 0], sizes = [4, 32], strides = [1, 1]} : vector<8x32xf32> to vector<4x32xf32>
    %cst_57 = arith.constant dense<0xFF800000> : vector<32xf32>
    %110 = vector.multi_reduction <maximumf>, %109, %cst_57 [0] : vector<4x32xf32> to vector<32xf32>
    %111 = vector.shape_cast %110 : vector<32xf32> to vector<1x32xf32>
    %112 = vector.extract_strided_slice %103 {offsets = [4, 0], sizes = [4, 32], strides = [1, 1]} : vector<8x32xf32> to vector<4x32xf32>
    %cst_58 = arith.constant dense<0xFF800000> : vector<32xf32>
    %113 = vector.multi_reduction <maximumf>, %112, %cst_58 [0] : vector<4x32xf32> to vector<32xf32>
    %114 = vector.shape_cast %113 : vector<32xf32> to vector<1x32xf32>
    %115 = tpu.concatenate %111, %114 in 0 : vector<1x32xf32>, vector<1x32xf32> -> vector<2x32xf32>
    %c0_59 = arith.constant 0 : index
    %c0_60 = arith.constant 0 : index
    %116 = vector.load %arg15[%c0_59, %c0_60] : memref<32x32xf32, #tpu.memory_space<vmem>>, vector<32x32xf32>
    %cst_61 = arith.constant dense<0.000000e+00> : vector<2x32xf32>
    %117 = tpu.matmul %115, %116, %cst_61 {dimension_numbers = #tpu.dot_dimension_numbers<[1], [0], [0], [1], [0, 0, 1, 1], [], []>} : vector<2x32xf32>, vector<32x32xf32>, vector<2x32xf32> -> vector<2x32xf32>
    %c0_62 = arith.constant 0 : index
    %c0_63 = arith.constant 0 : index
    %118 = vector.load %arg16[%c0_62, %c0_63] : memref<1x32xf32, #tpu.memory_space<vmem>>, vector<1x32xf32>
    %119 = vector.broadcast %118 : vector<1x32xf32> to vector<2x32xf32>
    %120 = arith.addf %117, %119 : vector<2x32xf32>
    %cst_64 = arith.constant 0.000000e+00 : f32
    %121 = vector.broadcast %cst_64 : f32 to vector<2x32xf32>
    %122 = arith.cmpf oge, %120, %121 : vector<2x32xf32>
    %cst_65 = arith.constant 0.00999999977 : f32
    %123 = vector.broadcast %cst_65 : f32 to vector<2x32xf32>
    %124 = arith.mulf %123, %120 : vector<2x32xf32>
    %125 = arith.select %122, %120, %124 : vector<2x32xi1>, vector<2x32xf32>
    %c0_66 = arith.constant 0 : index
    %c0_67 = arith.constant 0 : index
    %126 = vector.load %arg17[%c0_66, %c0_67] : memref<32x1xf32, #tpu.memory_space<vmem>>, vector<32x1xf32>
    %cst_68 = arith.constant dense<0.000000e+00> : vector<2x1xf32>
    %127 = tpu.matmul %125, %126, %cst_68 {dimension_numbers = #tpu.dot_dimension_numbers<[1], [0], [0], [1], [0, 0, 1, 1], [], []>} : vector<2x32xf32>, vector<32x1xf32>, vector<2x1xf32> -> vector<2x1xf32>
    %c0_69 = arith.constant 0 : index
    %c0_70 = arith.constant 0 : index
    %128 = vector.load %arg18[%c0_69, %c0_70] : memref<1x1xf32, #tpu.memory_space<vmem>>, vector<1x1xf32>
    %129 = vector.broadcast %128 : vector<1x1xf32> to vector<2x1xf32>
    %130 = arith.addf %127, %129 : vector<2x1xf32>
    %c0_71 = arith.constant 0 : index
    %c0_72 = arith.constant 0 : index
    %c0_73 = arith.constant 0 : index
    %131 = vector.load %arg19[%c0_71, %c0_72, %c0_73] : memref<1x2x1xf32, #tpu.memory_space<vmem>>, vector<1x2x1xf32>
    %132 = vector.shape_cast %131 : vector<1x2x1xf32> to vector<2x1xf32>
    %133 = vector.shape_cast %130 : vector<2x1xf32> to vector<1x2x1xf32>
    tpu.vector_store %arg19[%c0_71, %c0_72, %c0_73], %133 {strides = array<i32>} : memref<1x2x1xf32, #tpu.memory_space<vmem>>, vector<1x2x1xf32>,
    return
  }
  func.func @transform_0(%arg0: i32) -> (i32, i32, i32) {
    %c0_i32 = arith.constant 0 : i32
    %c0_i32_0 = arith.constant 0 : i32
    %c0_i32_1 = arith.constant 0 : i32
    return %arg0, %c0_i32, %c0_i32_0 : i32, i32, i32
  }
  func.func @transform_1(%arg0: i32) -> (i32, i32, i32) {
    %c0_i32 = arith.constant 0 : i32
    %c0_i32_0 = arith.constant 0 : i32
    %c0_i32_1 = arith.constant 0 : i32
    return %arg0, %c0_i32, %c0_i32_0 : i32, i32, i32
  }
  func.func @transform_2(%arg0: i32) -> (i32, i32) {
    %c0_i32 = arith.constant 0 : i32
    %c0_i32_0 = arith.constant 0 : i32
    %c0_i32_1 = arith.constant 0 : i32
    return %c0_i32, %c0_i32_0 : i32, i32
  }
  func.func @transform_3(%arg0: i32) -> (i32, i32) {
    %c0_i32 = arith.constant 0 : i32
    %c0_i32_0 = arith.constant 0 : i32
    %c0_i32_1 = arith.constant 0 : i32
    return %c0_i32, %c0_i32_0 : i32, i32
  }
  func.func @transform_4(%arg0: i32) -> (i32, i32) {
    %c0_i32 = arith.constant 0 : i32
    %c0_i32_0 = arith.constant 0 : i32
    %c0_i32_1 = arith.constant 0 : i32
    return %c0_i32, %c0_i32_0 : i32, i32
  }
  func.func @transform_5(%arg0: i32) -> (i32, i32) {
    %c0_i32 = arith.constant 0 : i32
    %c0_i32_0 = arith.constant 0 : i32
    %c0_i32_1 = arith.constant 0 : i32
    return %c0_i32, %c0_i32_0 : i32, i32
  }
  func.func @transform_6(%arg0: i32) -> (i32, i32) {
    %c0_i32 = arith.constant 0 : i32
    %c0_i32_0 = arith.constant 0 : i32
    %c0_i32_1 = arith.constant 0 : i32
    return %c0_i32, %c0_i32_0 : i32, i32
  }
  func.func @transform_7(%arg0: i32) -> (i32, i32) {
    %c0_i32 = arith.constant 0 : i32
    %c0_i32_0 = arith.constant 0 : i32
    %c0_i32_1 = arith.constant 0 : i32
    return %c0_i32, %c0_i32_0 : i32, i32
  }
  func.func @transform_8(%arg0: i32) -> (i32, i32) {
    %c0_i32 = arith.constant 0 : i32
    %c0_i32_0 = arith.constant 0 : i32
    %c0_i32_1 = arith.constant 0 : i32
    return %c0_i32, %c0_i32_0 : i32, i32
  }
  func.func @transform_9(%arg0: i32) -> (i32, i32) {
    %c0_i32 = arith.constant 0 : i32
    %c0_i32_0 = arith.constant 0 : i32
    %c0_i32_1 = arith.constant 0 : i32
    return %c0_i32, %c0_i32_0 : i32, i32
  }
  func.func @transform_10(%arg0: i32) -> (i32, i32) {
    %c0_i32 = arith.constant 0 : i32
    %c0_i32_0 = arith.constant 0 : i32
    %c0_i32_1 = arith.constant 0 : i32
    return %c0_i32, %c0_i32_0 : i32, i32
  }
  func.func @transform_11(%arg0: i32) -> (i32, i32) {
    %c0_i32 = arith.constant 0 : i32
    %c0_i32_0 = arith.constant 0 : i32
    %c0_i32_1 = arith.constant 0 : i32
    return %c0_i32, %c0_i32_0 : i32, i32
  }
  func.func @transform_12(%arg0: i32) -> (i32, i32) {
    %c0_i32 = arith.constant 0 : i32
    %c0_i32_0 = arith.constant 0 : i32
    %c0_i32_1 = arith.constant 0 : i32
    return %c0_i32, %c0_i32_0 : i32, i32
  }
  func.func @transform_13(%arg0: i32) -> (i32, i32) {
    %c0_i32 = arith.constant 0 : i32
    %c0_i32_0 = arith.constant 0 : i32
    %c0_i32_1 = arith.constant 0 : i32
    return %c0_i32, %c0_i32_0 : i32, i32
  }
  func.func @transform_14(%arg0: i32) -> (i32, i32) {
    %c0_i32 = arith.constant 0 : i32
    %c0_i32_0 = arith.constant 0 : i32
    %c0_i32_1 = arith.constant 0 : i32
    return %c0_i32, %c0_i32_0 : i32, i32
  }
  func.func @transform_15(%arg0: i32) -> (i32, i32) {
    %c0_i32 = arith.constant 0 : i32
    %c0_i32_0 = arith.constant 0 : i32
    %c0_i32_1 = arith.constant 0 : i32
    return %c0_i32, %c0_i32_0 : i32, i32
  }
  func.func @transform_16(%arg0: i32) -> (i32, i32) {
    %c0_i32 = arith.constant 0 : i32
    %c0_i32_0 = arith.constant 0 : i32
    %c0_i32_1 = arith.constant 0 : i32
    return %c0_i32, %c0_i32_0 : i32, i32
  }
  func.func @transform_17(%arg0: i32) -> (i32, i32) {
    %c0_i32 = arith.constant 0 : i32
    %c0_i32_0 = arith.constant 0 : i32
    %c0_i32_1 = arith.constant 0 : i32
    return %c0_i32, %c0_i32_0 : i32, i32
  }
  func.func @transform_18(%arg0: i32) -> (i32, i32, i32) {
    %c0_i32 = arith.constant 0 : i32
    %c0_i32_0 = arith.constant 0 : i32
    %c0_i32_1 = arith.constant 0 : i32
    return %arg0, %c0_i32, %c0_i32_0 : i32, i32, i32
  }
  func.func @transform_19(%arg0: i32) -> (i32, i32) {
    %c0_i32 = arith.constant 0 : i32
    %c0_i32_0 = arith.constant 0 : i32
    %c0_i32_1 = arith.constant 0 : i32
    return %c0_i32, %c0_i32_0 : i32, i32
  }
  func.func @transform_20(%arg0: i32) -> (i32, i32) {
    %c0_i32 = arith.constant 0 : i32
    %c0_i32_0 = arith.constant 0 : i32
    %c0_i32_1 = arith.constant 0 : i32
    return %c0_i32, %c0_i32_0 : i32, i32
  }
}

</mosaic_0001>

<bundles_post_ra>
// kernel: tpu_custom_call.1
= control target key start
LH: loop header
LB: loop body
LE: loop exit
PB: predicated region body
PF: predicated region fallthrough
CT: control target
= control target key end

     0   :  { %s3490_s0 = inlined_call_operand.hbm [shape: f32[4,8,16], index: 0, kind: input, shape index: {}]   ;;  %s3491_s1 = inlined_call_operand.hbm [shape: f32[4,8,32], index: 1, kind: input, shape index: {}]   ;;  %s3492_s2 = inlined_call_operand.vmem [shape: f32[8,32], index: 2, kind: input, shape index: {}]   ;;  %s3493_s3 = inlined_call_operand.hbm [shape: f32[8,8], index: 3, kind: input, shape index: {}]   ;;  %s3494_s4 = inlined_call_operand.hbm [shape: f32[16,32], index: 4, kind: input, shape index: {}]   ;;  %s3495_s5 = inlined_call_operand.vmem [shape: f32[1,32], index: 5, kind: input, shape index: {}]   ;;  %s3496_s6 = inlined_call_operand.hbm [shape: f32[32,96], index: 6, kind: input, shape index: {}]   ;;  %s3497_s7 = inlined_call_operand.vmem [shape: f32[1,96], index: 7, kind: input, shape index: {}]   ;;  %s3498_s8 = inlined_call_operand.hbm [shape: f32[32,32], index: 8, kind: input, shape index: {}]   ;;  %s3499_s9 = inlined_call_operand.hbm [shape: f32[1,32], index: 9, kind: input, shape index: {}]   ;;  %s3500_s10 = inlined_call_operand.vmem [shape: f32[64,128], index: 10, kind: input, shape index: {}]   ;;  %s3501_s11 = inlined_call_operand.hbm [shape: f32[1,128], index: 11, kind: input, shape index: {}]   ;;  %s3502_s12 = inlined_call_operand.vmem [shape: f32[8,32], index: 12, kind: input, shape index: {}]   ;;  %s3503_s13 = inlined_call_operand.hbm [shape: f32[8,32], index: 13, kind: input, shape index: {}]   ;;  %s3504_s14 = inlined_call_operand.hbm [shape: f32[32,32], index: 14, kind: input, shape index: {}]   ;;  %s3505_s15 = inlined_call_operand.vmem [shape: f32[1,32], index: 15, kind: input, shape index: {}]   ;;  %s3506_s16 = inlined_call_operand.vmem [shape: f32[32,1], index: 16, kind: input, shape index: {}]   ;;  %s3507_s17 = inlined_call_operand.<no memory space> [shape: f32[1,1], index: 17, kind: input, shape index: {}]   ;;  %s3508_s18 = inlined_call_operand.vmem [shape: f32[4,2,1], index: 18, kind: output, shape index: {0}]   ;;  %s3509_s19 = inlined_call_operand.hbm [shape: f32[8,32], index: 19, kind: output, shape index: {1}]   ;;  %s3510_s20 = inlined_call_operand.hbm [shape: f32[8,32], index: 20, kind: output, shape index: {2}]  }
   0x1   :  { %3524 = sst [smem:[#allocation34_spill]] %s3490_s0  ;;  %v26_v0 = vstv %s3507_s17 }
   0x2   :  { %3525 = sst [smem:[#allocation35_spill]] %s3491_s1  ;;  %27 = vst [vmem:[#allocation4] sm:$0x1] %v26_v0 }
   0x3   :  { %3526 = sst [smem:[#allocation36_spill]] %s3492_s2 }
   0x4   :  { %3527 = sst [smem:[#allocation37_spill]] %s3493_s3 }
   0x5   :  { %3528 = sst [smem:[#allocation38_spill]] %s3494_s4 }
   0x6   :  { %3529 = sst [smem:[#allocation39_spill]] %s3495_s5 }
   0x7   :  { %3530 = sst [smem:[#allocation40_spill]] %s3496_s6 }
   0x8   :  { %3531 = sst [smem:[#allocation41_spill]] %s3497_s7 }
   0x9   :  { %3532 = sst [smem:[#allocation42_spill]] %s3498_s8 }
   0xa   :  { %3533 = sst [smem:[#allocation43_spill]] %s3499_s9 }
   0xb   :  { %3534 = sst [smem:[#allocation44_spill]] %s3500_s10 }
   0xc   :  { %3535 = sst [smem:[#allocation45_spill]] %s3505_s15 }
   0xd   :  { %3536 = sst [smem:[#allocation46_spill]] %s3506_s16 }
   0xe   :  { %3537 = sst [smem:[#allocation47_spill]] %s3509_s19 }
   0xf   :  { %3538 = sst [smem:[#allocation48_spill]] %s3510_s20 }
  0x10   :  { %28 = vsyncpa [#allocation6], 0 }
  0x11   :  { %30 = vsyncpa [#allocation6 + $0x1], 0 }
  0x12   :  { %31 = vsyncpa [#allocation9], 0 }
  0x13   :  { %33 = vsyncpa [#allocation9 + $0x1], 0 }
  0x14   :  { %34 = vsyncpa [#allocation12], 0 }
  0x15   :  { %35 = vsyncpa [#allocation15], 0 }
  0x16   :  { %36 = vsyncpa [#allocation18], 0 }
  0x17   :  { %37 = vsyncpa [#allocation21], 0 }
  0x18   :  { %38 = vsyncpa [#allocation7], 0 }
  0x19   :  { %39 = vsyncpa [#allocation24], 0  ;;  %s2945_s23 = smov 0   ;;  %s2947_s24 = smov 0  }
  0x1a   :  { %s2949_s2 = smov 0   ;;  %s2951_s25 = smov 0  }
  0x1b LB: > { %s2814_s17 = smov [#allocation10]   ;;  %s2966_s26 = sadd.s32 4294967295, %s2812_s25   ;;  %s2812_s25 = sphi %s2951_s25, %s3577_s25   ;;  %s2808_s2 = sphi %s2949_s2, %s3576_s2   ;;  %s2804_s24 = sphi %s2947_s24, %s3575_s24   ;;  %s2800_s23 = sphi %s2945_s23, %s3574_s23  }
  0x1c   : > { %s522_s3 = sshll.u32 %s2814_s17, 4  ;;  %p2014_p0 = scmp.ge.s32.totalorder %s2812_s25, 1  ;;  %s523_s3 = int_to_ptr.vmem [resolvable:$true] %s522_s3 }
  0x1d   : > { %p3517_p1 = scmp.eq.s32.totalorder %s2966_s26, 0  ;;  %p506_p2 = scmp.lt.s32.totalorder %s2812_s25, 5 }
  0x1e   : > { %s2815_s28 = smov [#allocation11]   ;;  %s2816_s30 = smov [#allocation14]  }
  0x1f   : > { %p2972_p4 = pnand %p2014_p0, %p506_p2  ;;  %s532_s4 = sshll.u32 %s2815_s28, 4  ;;  %s2978_s4 = int_to_ptr.vmem [resolvable:$true] %s532_s4 }
  0x20   : > { %s564_s0 = sshll.u32 %s2816_s30, 4  ;;  %s3541_s22 = sld [smem:[#allocation37_spill]]  ;;  %s2986_s0 = int_to_ptr.vmem [resolvable:$true] %s564_s0 }
  0x21   : > { %s3539_s27 = scalar_select %p2972_p4, 1, 0 }
  0x22   : > { %p2288_p5 = pneg %p2972_p4 }
  0x24   : > { %p2982_p6 = pnand %p2288_p5, %p3517_p1 }
  0x26   : > { %s2410_s17 = scalar_lea.hbm %s3541_s22, 128  ;;  %p2996_p8 = pneg %p2982_p6 }
  0x27   : > { %p2411_p7 = scmp.ne.s32.totalorder %s3541_s22, %s2410_s17  ;;  %p2417_p11 = scmp.lt.u32.totalorder %s2410_s17, %s3541_s22 }
  0x29   : > { %p2413_p9 = pnand %p2996_p8, %p2411_p7 }
  0x2b   : > { %p2414_p10 = pneg %p2413_p9 }
  0x2d   : > { %p2419_p12 = pnand %p2417_p11, %p2414_p10 }
  0x2f   : > { %2422 = shalt.err (!%p2419_p12)
}
  0x30   : > { %s2423_s21 = scalar_lea.vmem %s523_s3, 128  ;;  %p2431_p5 = scmp.lt.s32.totalorder %s523_s3, %s523_s3 }
  0x31   : > { %p2424_p13 = scmp.ne.s32.totalorder %s523_s3, %s2423_s21  ;;  %p2432_p3 = scmp.lt.s32.totalorder %s2423_s21, %s2423_s21 }
  0x33   : > { %p2426_p0 = pnand %p2424_p13, %p2996_p8  ;;  %p2433_p1 = por %p2432_p3, %p2431_p5 }
  0x35   : > { %p2427_p2 = pneg %p2426_p0 }
  0x37   : > { %p2434_p4 = pnand %p2433_p1, %p2427_p2 }
  0x39   : > { %2437 = shalt.err (!%p2434_p4)
}
  0x3a   : > { %2291 = dma.hbm_to_vmem [thread:$0]  (!%p2982_p6), %s3541_s22, 128, %s523_s3, [#allocation9]  }
  0x3b   : > { %s3543_s17 = sld [smem:[#allocation38_spill]] }
  0x41   : > { %s2438_s30 = scalar_lea.hbm %s3543_s17, 256 }
  0x42   : > { %p2439_p7 = scmp.ne.s32.totalorder %s3543_s17, %s2438_s30  ;;  %p2445_p1 = scmp.lt.u32.totalorder %s2438_s30, %s3543_s17 }
  0x44   : > { %p2441_p9 = pnand %p2439_p7, %p2996_p8 }
  0x46   : > { %p2442_p3 = pneg %p2441_p9 }
  0x48   : > { %p2447_p4 = pnand %p2445_p1, %p2442_p3 }
  0x4a   : > { %2450 = shalt.err (!%p2447_p4)
}
  0x4b   : > { %s2451_s3 = scalar_lea.vmem %s2978_s4, 256  ;;  %p2459_p13 = scmp.lt.s32.totalorder %s2978_s4, %s2978_s4 }
  0x4c   : > { %p2452_p10 = scmp.ne.s32.totalorder %s2978_s4, %s2451_s3  ;;  %p2460_p0 = scmp.lt.s32.totalorder %s2451_s3, %s2451_s3 }
  0x4e   : > { %p2454_p11 = pnand %p2452_p10, %p2996_p8  ;;  %p2461_p2 = por %p2460_p0, %p2459_p13 }
  0x50   : > { %p2455_p12 = pneg %p2454_p11 }
  0x52   : > { %p2462_p5 = pnand %p2461_p2, %p2455_p12 }
  0x54   : > { %2465 = shalt.err (!%p2462_p5)
}
  0x55   : > { %s2817_s10 = smov 128   ;;  %s2818_s7 = smov 8  }
  0x56   : > { %2294 = dma.hbm_to_vmem [thread:$0]  (!%p2982_p6), %s3543_s17, 256, %s2978_s4, [#allocation12], %s2817_s10, %s2817_s10, %s2818_s7  }
  0x57   : > { %s3544_s8 = sld [smem:[#allocation42_spill]] }
  0x5d   : > { %s2466_s1 = scalar_lea.hbm %s3544_s8, 512 }
  0x5e   : > { %p2467_p7 = scmp.ne.s32.totalorder %s3544_s8, %s2466_s1  ;;  %p2473_p1 = scmp.lt.u32.totalorder %s2466_s1, %s3544_s8 }
  0x60   : > { %p2469_p9 = pnand %p2467_p7, %p2996_p8 }
  0x62   : > { %p2470_p3 = pneg %p2469_p9 }
  0x64   : > { %p2475_p4 = pnand %p2473_p1, %p2470_p3 }
  0x66   : > { %2478 = shalt.err (!%p2475_p4)
}
  0x67   : > { %s2479_s4 = scalar_lea.vmem %s2986_s0, 512  ;;  %p2487_p13 = scmp.lt.s32.totalorder %s2986_s0, %s2986_s0 }
  0x68   : > { %p2480_p10 = scmp.ne.s32.totalorder %s2986_s0, %s2479_s4  ;;  %p2488_p0 = scmp.lt.s32.totalorder %s2479_s4, %s2479_s4 }
  0x6a   : > { %p2482_p11 = pnand %p2480_p10, %p2996_p8  ;;  %p2489_p2 = por %p2488_p0, %p2487_p13 }
  0x6c   : > { %p2483_p12 = pneg %p2482_p11 }
  0x6e   : > { %p2490_p5 = pnand %p2489_p2, %p2483_p12 }
  0x70   : > { %2493 = shalt.err (!%p2490_p5)
}
  0x71   : > { %2300 = dma.hbm_to_vmem [thread:$0]  (!%p2982_p6), %s3544_s8, 512, %s2986_s0, [#allocation15], %s2817_s10, %s2817_s10, %s2818_s7  }
  0x72   : > { %s2819_s19 = smov [#allocation17]   ;;  %s2820_s15 = smov [#allocation13]  }
  0x73   : > { %s592_s20 = sshll.u32 %s2819_s19, 4  ;;  %s548_s1 = sshll.u32 %s2820_s15, 4  ;;  %s593_s20 = int_to_ptr.vmem [resolvable:$true] %s592_s20  ;;  %s549_s1 = int_to_ptr.vmem [resolvable:$true] %s548_s1 }
  0x74   : > { %s2494_s3 = scalar_lea.hbm %s3501_s11, 16 }
  0x75   : > { %p2495_p7 = scmp.ne.s32.totalorder %s3501_s11, %s2494_s3  ;;  %p2501_p1 = scmp.lt.u32.totalorder %s2494_s3, %s3501_s11 }
  0x77   : > { %p2497_p9 = pnand %p2495_p7, %p2996_p8 }
  0x79   : > { %p2498_p3 = pneg %p2497_p9 }
  0x7b   : > { %p2503_p4 = pnand %p2501_p1, %p2498_p3 }
  0x7d   : > { %2506 = shalt.err (!%p2503_p4)
}
  0x7e   : > { %s2507_s0 = scalar_lea.vmem %s593_s20, 16  ;;  %s2514_s16 = scalar_lea.vmem %s593_s20, 32 }
  0x7f   : > { %p2508_p10 = scmp.ne.s32.totalorder %s593_s20, %s2507_s0  ;;  %p2515_p13 = scmp.lt.s32.totalorder %s593_s20, %s593_s20 }
  0x80   : > { %p2516_p0 = scmp.lt.s32.totalorder %s2514_s16, %s2507_s0 }
  0x81   : > { %p2510_p11 = pnand %p2508_p10, %p2996_p8 }
  0x82   : > { %p2517_p2 = por %p2516_p0, %p2515_p13 }
  0x83   : > { %p2511_p12 = pneg %p2510_p11 }
  0x85   : > { %p2518_p5 = pnand %p2517_p2, %p2511_p12 }
  0x87   : > { %2521 = shalt.err (!%p2518_p5)
}
  0x88   : > { %2306 = dma.hbm_to_vmem [thread:$0]  (!%p2982_p6), %s3501_s11, 16, %s593_s20, [#allocation18]  }
  0x89   : > { %s3545_s6 = sld [smem:[#allocation40_spill]] }
  0x8f   : > { %s2522_s30 = scalar_lea.hbm %s3545_s6, 512 }
  0x90   : > { %p2523_p7 = scmp.ne.s32.totalorder %s3545_s6, %s2522_s30  ;;  %p2529_p1 = scmp.lt.u32.totalorder %s2522_s30, %s3545_s6 }
  0x92   : > { %p2525_p9 = pnand %p2523_p7, %p2996_p8 }
  0x94   : > { %p2526_p3 = pneg %p2525_p9 }
  0x96   : > { %p2531_p4 = pnand %p2529_p1, %p2526_p3 }
  0x98   : > { %2534 = shalt.err (!%p2531_p4)
}
  0x99   : > { %s2535_s0 = scalar_lea.vmem %s549_s1, 512  ;;  %p2543_p13 = scmp.lt.s32.totalorder %s549_s1, %s549_s1 }
  0x9a   : > { %p2536_p10 = scmp.ne.s32.totalorder %s549_s1, %s2535_s0  ;;  %p2544_p0 = scmp.lt.s32.totalorder %s2535_s0, %s2535_s0 }
  0x9c   : > { %p2538_p11 = pnand %p2536_p10, %p2996_p8  ;;  %p2545_p2 = por %p2544_p0, %p2543_p13 }
  0x9e   : > { %p2539_p12 = pneg %p2538_p11 }
  0xa0   : > { %p2546_p5 = pnand %p2545_p2, %p2539_p12 }
  0xa2   : > { %2549 = shalt.err (!%p2546_p5)
}
  0xa3   : > { %2297 = dma.hbm_to_vmem [thread:$0]  (!%p2982_p6), %s3545_s6, 512, %s549_s1, [#allocation12], %s2817_s10, %s2817_s10, %s2818_s7  }
  0xa4   : > { %s2821_s17 = smov [#allocation16]   ;;  %s2822_s5 = smov [#allocation19]  }
  0xa5   : > { %s578_s19 = sshll.u32 %s2821_s17, 4  ;;  %s606_s15 = sshll.u32 %s2822_s5, 4  ;;  %s579_s19 = int_to_ptr.vmem [resolvable:$true] %s578_s19  ;;  %s607_s15 = int_to_ptr.vmem [resolvable:$true] %s606_s15 }
  0xa6   : > { %s3546_s9 = sld [smem:[#allocation43_spill]] }
  0xac   : > { %s2550_s3 = scalar_lea.hbm %s3546_s9, 16 }
  0xad   : > { %p2551_p7 = scmp.ne.s32.totalorder %s3546_s9, %s2550_s3  ;;  %p2557_p1 = scmp.lt.u32.totalorder %s2550_s3, %s3546_s9 }
  0xaf   : > { %p2553_p9 = pnand %p2551_p7, %p2996_p8 }
  0xb1   : > { %p2554_p3 = pneg %p2553_p9 }
  0xb3   : > { %p2559_p4 = pnand %p2557_p1, %p2554_p3 }
  0xb5   : > { %2562 = shalt.err (!%p2559_p4)
}
  0xb6   : > { %s2563_s1 = scalar_lea.vmem %s579_s19, 16  ;;  %s2570_s16 = scalar_lea.vmem %s579_s19, 32 }
  0xb7   : > { %p2564_p10 = scmp.ne.s32.totalorder %s579_s19, %s2563_s1  ;;  %p2571_p13 = scmp.lt.s32.totalorder %s579_s19, %s579_s19 }
  0xb8   : > { %p2572_p0 = scmp.lt.s32.totalorder %s2570_s16, %s2563_s1 }
  0xb9   : > { %p2566_p11 = pnand %p2564_p10, %p2996_p8 }
  0xba   : > { %p2573_p2 = por %p2572_p0, %p2571_p13 }
  0xbb   : > { %p2567_p12 = pneg %p2566_p11 }
  0xbd   : > { %p2574_p5 = pnand %p2573_p2, %p2567_p12 }
  0xbf   : > { %2577 = shalt.err (!%p2574_p5)
}
  0xc0   : > { %2303 = dma.hbm_to_vmem [thread:$0]  (!%p2982_p6), %s3546_s9, 16, %s579_s19, [#allocation15]  }
  0xc1   : > { %s2578_s3 = scalar_lea.hbm %s3503_s13, 128 }
  0xc2   : > { %p2579_p7 = scmp.ne.s32.totalorder %s3503_s13, %s2578_s3  ;;  %p2585_p1 = scmp.lt.u32.totalorder %s2578_s3, %s3503_s13 }
  0xc4   : > { %p2581_p9 = pnand %p2579_p7, %p2996_p8 }
  0xc6   : > { %p2582_p3 = pneg %p2581_p9 }
  0xc8   : > { %p2587_p4 = pnand %p2585_p1, %p2582_p3 }
  0xca   : > { %2590 = shalt.err (!%p2587_p4)
}
  0xcb   : > { %s2591_s1 = scalar_lea.vmem %s607_s15, 128  ;;  %p2599_p13 = scmp.lt.s32.totalorder %s607_s15, %s607_s15 }
  0xcc   : > { %p2592_p10 = scmp.ne.s32.totalorder %s607_s15, %s2591_s1  ;;  %p2600_p0 = scmp.lt.s32.totalorder %s2591_s1, %s2591_s1 }
  0xce   : > { %p2594_p11 = pnand %p2592_p10, %p2996_p8  ;;  %p2601_p2 = por %p2600_p0, %p2599_p13 }
  0xd0   : > { %p2595_p12 = pneg %p2594_p11 }
  0xd2   : > { %p2602_p5 = pnand %p2601_p2, %p2595_p12 }
  0xd4   : > { %2605 = shalt.err (!%p2602_p5)
}
  0xd5   : > { %2309 = dma.hbm_to_vmem [thread:$0]  (!%p2982_p6), %s3503_s13, 128, %s607_s15, [#allocation18]  }
  0xd6   : > { %s2823_s17 = smov [#allocation20]   ;;  %s2606_s3 = scalar_lea.hbm %s3504_s14, 512 }
  0xd7   : > { %s616_s5 = sshll.u32 %s2823_s17, 4  ;;  %p2607_p7 = scmp.ne.s32.totalorder %s3504_s14, %s2606_s3  ;;  %s617_s5 = int_to_ptr.vmem [resolvable:$true] %s616_s5 }
  0xd8   : > { %p2613_p1 = scmp.lt.u32.totalorder %s2606_s3, %s3504_s14 }
  0xd9   : > { %p2609_p9 = pnand %p2607_p7, %p2996_p8 }
  0xdb   : > { %p2610_p3 = pneg %p2609_p9 }
  0xdd   : > { %p2615_p4 = pnand %p2613_p1, %p2610_p3 }
  0xdf   : > { %2618 = shalt.err (!%p2615_p4)
}
  0xe0   : > { %s2619_s15 = scalar_lea.vmem %s617_s5, 512  ;;  %p2627_p13 = scmp.lt.s32.totalorder %s617_s5, %s617_s5 }
  0xe1   : > { %p2620_p10 = scmp.ne.s32.totalorder %s617_s5, %s2619_s15  ;;  %p2628_p0 = scmp.lt.s32.totalorder %s2619_s15, %s2619_s15 }
  0xe3   : > { %p2622_p11 = pnand %p2620_p10, %p2996_p8  ;;  %p2629_p2 = por %p2628_p0, %p2627_p13 }
  0xe5   : > { %p2623_p12 = pneg %p2622_p11 }
  0xe7   : > { %p2630_p5 = pnand %p2629_p2, %p2623_p12 }
  0xe9   : > { %2633 = shalt.err (!%p2630_p5)
}
  0xea   : > { %2312 = dma.hbm_to_vmem [thread:$0]  (!%p2982_p6), %s3504_s14, 512, %s617_s5, [#allocation21], %s2817_s10, %s2817_s10, %s2818_s7  }
  0xeb   : > { %s3161_s29 = sadd.s32 1, %s2812_s25   ;;  %s52_s28 = sadd.s32 1, %s2808_s2 }
  0xec   : > { %s49_s16 = ssub.s32 %s2812_s25, %s3161_s29  ;;  %p59_p8 = scmp.ne.s32.totalorder %s2808_s2, %s2804_s24 }
  0xed   : > { %p50_p7 = scmp.eq.s32.totalorder %s49_s16, 0  ;;  %p60_p9 = scmp.eq.s32.totalorder %s2812_s25, 0 }
  0xee   : > { %p65_p3 = scmp.ne.s32.totalorder %s2804_s24, %s2800_s23  ;;  %p2328_p1 = scmp.lt.s32.totalorder %s2812_s25, 4 }
  0xef   : > { %s3173_s17 = scalar_select %p50_p7, %s2808_s2, %s52_s28  }
  0xf0   : > { %p61_p4 = por %p60_p9, %p59_p8  ;;  %p3547_p10 = scmp.eq.s32.totalorder %s2966_s26, 0 }
  0xf1   : > { %s639_s21 = sand.u32 1, %s2808_s2   ;;  %s2025_s10 = sshll.u32 %s2812_s25, 7 }
  0xf2   : > { %p3177_p11 = por %p3547_p10, %p65_p3  ;;  %s3183_s7 = sshll.u32 %s639_s21, 3 }
  0xf3   : > { %s3549_s4 = sld [smem:[#allocation34_spill]]  ;;  %s643_s23 = scalar_lea.vmem [#allocation5], %s3183_s7 }
  0xf4   : > { %s3548_s30 = scalar_select %p3177_p11, 1, 0 }
  0xf5   : > { %s650_s0 = sshll.u32 %s643_s23, 4  ;;  %p3191_p6 = pnand %p2328_p1, %p61_p4  ;;  %s3195_s0 = int_to_ptr.vmem [resolvable:$true] %s650_s0 }
  0xf6   : > { %s3551_s19 = sld [smem:[#allocation35_spill]]  ;;  %s640_s16 = scalar_lea.sflag [#allocation6], %s639_s21 }
  0xf7   : > { %p2636_p13 = pneg %p3191_p6 }
  0xf9   : > { %s3188_s22 = scalar_lea.hbm %s3549_s4, %s2025_s10  ;;  %s2639_s6 = scalar_lea.hbm %s3549_s4, 512 }
  0xfa   : > { %s2634_s5 = scalar_lea.hbm %s3188_s22, 128  ;;  %p2640_p5 = scmp.lt.u32.totalorder %s3188_s22, %s3549_s4 }
  0xfb   : > { %p2635_p12 = scmp.ne.s32.totalorder %s3188_s22, %s2634_s5  ;;  %p2641_p8 = scmp.lt.u32.totalorder %s2639_s6, %s2634_s5 }
  0xfc   : > { %s3200_s28 = scalar_lea.hbm %s3551_s19, %s2025_s10  ;;  %p2643_p9 = scmp.lt.u32.totalorder %s2634_s5, %s3188_s22 }
  0xfd   : > { %p2637_p0 = pnand %p2636_p13, %p2635_p12  ;;  %p2642_p7 = por %p2641_p8, %p2640_p5 }
  0xff   : > { %p2638_p2 = pneg %p2637_p0  ;;  %p2644_p3 = por %p2643_p9, %p2642_p7 }
 0x101   : > { %p2645_p1 = pnand %p2644_p3, %p2638_p2 }
 0x103   : > { %2648 = shalt.err (!%p2645_p1)
}
 0x104   : > { %s2649_s21 = scalar_lea.vmem %s3195_s0, 128  ;;  %s2824_s10 = smov [#allocation5]  }
 0x105   : > { %p2650_p4 = scmp.ne.s32.totalorder %s3195_s0, %s2649_s21  ;;  %s2654_s15 = sshll.u32 %s2824_s10, 4  ;;  %s2655_s15 = int_to_ptr.vmem [resolvable:$false] %s2654_s15 }
 0x106   : > { %s2656_s8 = scalar_lea.vmem %s2655_s15, 256  ;;  %p2657_p0 = scmp.lt.s32.totalorder %s3195_s0, %s2655_s15 }
 0x107   : > { %p2652_p10 = pnand %p2650_p4, %p2636_p13  ;;  %p2658_p5 = scmp.lt.s32.totalorder %s2656_s8, %s2649_s21 }
 0x109   : > { %p2653_p12 = pneg %p2652_p10  ;;  %p2659_p8 = por %p2658_p5, %p2657_p0 }
 0x10b   : > { %p2660_p7 = pnand %p2659_p8, %p2653_p12 }
 0x10d   : > { %2663 = shalt.err (!%p2660_p7)
}
 0x10e   : > { %2316 = dma.hbm_to_vmem [thread:$0]  (!%p3191_p6), %s3188_s22, 128, %s3195_s0, %s640_s16  }
 0x10f   : > { %s657_s6 = sand.u32 1, %s2812_s25   ;;  %s661_s9 = scalar_lea.vmem [#allocation8], %s3183_s7 }
 0x110   : > { %s668_s1 = sshll.u32 %s661_s9, 4  ;;  %s658_s5 = scalar_lea.sflag [#allocation9], %s657_s6  ;;  %s669_s1 = int_to_ptr.vmem [resolvable:$true] %s668_s1 }
 0x111   : > { %s2664_s3 = scalar_lea.hbm %s3200_s28, 128  ;;  %s2669_s10 = scalar_lea.hbm %s3551_s19, 512 }
 0x112   : > { %p2665_p2 = scmp.ne.s32.totalorder %s3200_s28, %s2664_s3  ;;  %p2670_p1 = scmp.lt.u32.totalorder %s3200_s28, %s3551_s19 }
 0x113   : > { %p2671_p4 = scmp.lt.u32.totalorder %s2669_s10, %s2664_s3  ;;  %p2673_p12 = scmp.lt.u32.totalorder %s2664_s3, %s3200_s28 }
 0x114   : > { %p2667_p9 = pnand %p2665_p2, %p2636_p13 }
 0x115   : > { %p2672_p10 = por %p2671_p4, %p2670_p1 }
 0x116   : > { %p2668_p3 = pneg %p2667_p9 }
 0x117   : > { %p2674_p0 = por %p2673_p12, %p2672_p10 }
 0x119   : > { %p2675_p5 = pnand %p2674_p0, %p2668_p3 }
 0x11b   : > { %2678 = shalt.err (!%p2675_p5)
}
 0x11c   : > { %s2679_s25 = scalar_lea.vmem %s669_s1, 128  ;;  %s2825_s7 = smov [#allocation8]  }
 0x11d   : > { %p2680_p8 = scmp.ne.s32.totalorder %s669_s1, %s2679_s25  ;;  %s2684_s22 = sshll.u32 %s2825_s7, 4  ;;  %s2685_s22 = int_to_ptr.vmem [resolvable:$false] %s2684_s22 }
 0x11e   : > { %s2686_s0 = scalar_lea.vmem %s2685_s22, 256  ;;  %p2687_p9 = scmp.lt.s32.totalorder %s669_s1, %s2685_s22 }
 0x11f   : > { %p2682_p7 = pnand %p2680_p8, %p2636_p13  ;;  %p2688_p11 = scmp.lt.s32.totalorder %s2686_s0, %s2679_s25 }
 0x121   : > { %p2683_p2 = pneg %p2682_p7  ;;  %p2689_p1 = por %p2688_p11, %p2687_p9 }
 0x123   : > { %p2690_p4 = pnand %p2689_p1, %p2683_p2 }
 0x125   : > { %2693 = shalt.err (!%p2690_p4)
}
 0x126   : > { %2319 = dma.hbm_to_vmem [thread:$0]  (!%p3191_p6), %s3200_s28, 128, %s669_s1, %s658_s5  }
 0x127   : > { %p3552_p3 = scmp.ne.s32.totalorder %s3539_s27, 0 }
 0x128   : > { %s679_s16 = sand.u32 (!%p3552_p3), 1, %s2804_s24   ;;  %p3553_p13 = scmp.ne.s32.totalorder (!%p3552_p3), %s3548_s30, 0 }
 0x129   : > { %677 = sbr.rel (%p3552_p3) target bundleno = 3655 (0xe47), region = 92  ;;  %s3251_s6 = sshll.u32 (!%p3552_p3), %s679_s16, 3 }
 0x12a   : > { %s680_s9 = scalar_lea.sflag (!%p3552_p3), [#allocation6], %s679_s16  ;;  %s683_s3 = scalar_lea.vmem (!%p3552_p3), [#allocation5], %s3251_s6 }
 0x130   : > { %2763 = dma.done.wait (%p3553_p13), %s680_s9, 128  }
 0x131   : > { %2765 = vsyncadd (%p3553_p13), %s680_s9, 4294967168  ;;  %s688_s20 = sand.u32 1, %s2966_s26   ;;  %s692_s27 = scalar_lea.vmem [#allocation8], %s3251_s6 }
 0x132   : > { %s689_s28 = scalar_lea.sflag [#allocation9], %s688_s20 }
 0x133   : > { %2767 = dma.done.wait (%p3553_p13), %s689_s28, 128  }
 0x134   : > { %2769 = vsyncadd (%p3553_p13), %s689_s28, 4294967168  ;;  %p3554_p11 = scmp.eq.s32.totalorder %s2966_s26, 0 }
 0x136   : > { %2771 = dma.done.wait (%p3554_p11), [#allocation9], 128   ;;  %p3555_p6 = pmov %p3554_p11 }
 0x138   : > { %2773 = vsyncadd (%p3555_p6), [#allocation9], 4294967168  ;;  %p3556_p10 = pmov %p3555_p6 }
 0x139   : > { %p3557_p12 = pmov %p3555_p6 }
 0x13a   : > { %2775 = dma.done.wait (%p3556_p10), [#allocation12], 768  }
 0x13b   : > { %2777 = vsyncadd (%p3557_p12), [#allocation12], 4294966528  ;;  %p3558_p0 = pmov %p3555_p6 }
 0x13d   : > { %2779 = dma.done.wait (%p3558_p0), [#allocation15], 528   ;;  %p3559_p5 = pmov %p3558_p0 }
 0x13e   : > { %p3560_p8 = pmov %p3558_p0 }
 0x13f   : > { %2781 = vsyncadd (%p3559_p5), [#allocation15], 4294966768 }
 0x140   : > { %2783 = dma.done.wait (%p3560_p8), [#allocation18], 144   ;;  %p3561_p7 = pmov %p3558_p0 }
 0x141   : > { %p3562_p2 = pmov %p3558_p0 }
 0x142   : > { %2785 = vsyncadd (%p3561_p7), [#allocation18], 4294967152 }
 0x143   : > { %2787 = dma.done.wait (%p3562_p2), [#allocation21], 512   ;;  %p3563_p9 = pmov %p3558_p0 }
 0x144   : > { %p785_p1 = scmp.lt.s32.totalorder %s2966_s26, 3  ;;  %p3564_p4 = scmp.ne.s32.totalorder %s2966_s26, 0 }
 0x145   : > { %2789 = vsyncadd (%p3563_p9), [#allocation21], 4294966784  ;;  %v793_v1 = vld [vmem:[%s3502_s12] sm:$0xff] (!%p3564_p4)  ;;  %vm794_vm0 = vcmask (!%p3564_p4), 261120   ;;  %v796_v2 = vld [vmem:[#allocation19] sm:$0xff] (!%p3564_p4) }
 0x146   : > { %s786_s30 = scalar_select %p785_p1, %s2966_s26, 3 }
 0x147   : > { %792 = sbr.rel (%p3564_p4) target bundleno = 334 (0x14e), region = 136  ;;  %795 = vst.msk [vmem:[#allocation2] sm:$0xff] (!%p3564_p4), %vm794_vm0, %v793_v1  ;;  %797 = vst.msk [vmem:[#allocation3] sm:$0xff] (!%p3564_p4), %vm794_vm0, %v796_v2 }
 0x148   : > { %s2039_s1 = sshll.u32 %s786_s30, 1 }
 0x149   : > { %s3289_s21 = scalar_lea.vmem %s3508_s18, %s2039_s1 }
 0x14e PF: > { %v799_v3 = vld [vmem:[#allocation11] sm:$0xff]  ;;  %v800_v4 = vld [vmem:[#allocation11 + $0x8] sm:$0xff]  ;;  %v2826_v5 = vmov 0.0|0.0   ;;  %vm2827_vm1 = vmmov 0   ;;  %v2828_v7 = vmov 0.0   ;;  %vm808_vm2 = vcmask 130048  }
 0x14f   : > { %2202 = vmatprep.subr.bf16.mxu0 %v2826_v5  ;;  %v2203_v6 = vpack.c.bf16 %v800_v4, %v799_v3  ;;  %2113 = vmatprep.mubr.msk.f32.mxu0 %vm2827_vm1, %v2828_v7  ;;  %v798_v8 = vld [vmem:[%s683_s3] sm:$0xff]  ;;  %v887_v9 = vld [vmem:[#allocation13] sm:$0xff]  ;;  %v890_v13 = vld [vmem:[#allocation13 + $0x18] sm:$0xff]  ;;  %s3565_s7 = sld [smem:[#allocation39_spill]]  ;;  %s3566_s16 = sld [smem:[#allocation36_spill]]  ;;  %vm898_vm4 = vcmask 261120  }
 0x150   : > { %2205 = vmatprep.subr.bf16.mxu1 %v2826_v5  ;;  %2124 = vmatprep.mubr.msk.f32.mxu1 %vm2827_vm1, %v2828_v7  ;;  %v888_v10 = vld [vmem:[#allocation13 + $0x8] sm:$0xff]  ;;  %v889_v12 = vld [vmem:[#allocation13 + $0x10] sm:$0xff]  ;;  %s3567_s20 = sld [smem:[#allocation41_spill]]  ;;  %s2829_s28 = smov 64   ;;  %vm1060_vm5 = vcmask 64512   ;;  %v1148_v40 = vld [vmem:[#allocation14] sm:$0xff] }
 0x151   : > { %2204 = vmatpush3.bf16.msra.mxu0 %v2203_v6  ;;  %v2206_v11 = vpack.c.bf16 %v888_v10, %v887_v9  ;;  %v2209_v14 = vpack.c.bf16 %v890_v13, %v889_v12  ;;  %s2830_s30 = smov 96   ;;  %s2831_s1 = smov 80   ;;  %v1058_v30 = vld [vmem:[#allocation10] sm:$0xff]  ;;  %v1391_v62 = vld [vmem:[#allocation14 + $0x10] sm:$0xff]  ;;  %v1392_v63 = vld [vmem:[#allocation14 + $0x18] sm:$0xff]  ;;  %vm1492_vm6 = vcmask 523264  }
 0x152   : > { %2127 = vmatprep.subr.mxu0 %v2828_v7  ;;  %s2832_s5 = smov 112   ;;  %v1149_v41 = vld [vmem:[#allocation14 + $0x8] sm:$0xff]  ;;  %s2833_s23 = smov 48   ;;  %v2215_v1 = vpack.c.bf16 %v1392_v63, %v1391_v62  ;;  %v1467_v3 = vld [vmem:[%s692_s27] sm:$0xff] }
 0x153   : > { %2207 = vmatpush3.bf16.msra.mxu1 %v2206_v11  ;;  %v2212_v42 = vpack.c.bf16 %v1149_v41, %v1148_v40  ;;  %v1468_v4 = vld [vmem:[#allocation2] sm:$0xff]  ;;  %s3568_s8 = sld [smem:[#allocation44_spill]]  ;;  %s2834_s6 = smov 32  }
 0x154   : > { %2114 = vmatmul.mubr.msk.f32.vlgmr.msra.gmra.mrb[0].mxu0 %vm808_vm2, %v798_v8  ;;  %2208 = vmatprep.subr.bf16.mxu1 %v2826_v5  ;;  %v1469_v8 = vmul.f32 %v1468_v4, %v1467_v3  ;;  %p2057_p3 = scmp.ne.s32.totalorder %s2966_s26, 3 }
 0x155   : > { %2129 = vmatprep.mubr.msk.f32.mxu0 %vm2827_vm1, %v2828_v7  ;;  %v2041_v15 = vld [vmem:[%s3565_s7] ss:$0 sm:$0xff] }
 0x156   : > { %v885_v20 = vld [vmem:[%s3566_s16] sm:$0xff] }
 0x157   : > { %2210 = vmatpush3.bf16.msra.mxu1 %v2209_v14  ;;  %v2043_v23 = vld [vmem:[%s3567_s20] ss:$0 sm:$0xff] }
 0x158   : > { %2211 = vmatprep.subr.bf16.mxu1 %v2826_v5 }
 0x159   : > { %v1477_v6 = vld [vmem:[%s3568_s8] sm:$0xff]  ;;  %v1478_v9 = vld [vmem:[%s3568_s8 + $0x8] sm:$0xff]  ;;  %v1479_v10 = vld [vmem:[%s3568_s8 + $0x10] sm:$0xff] }
 0x15a   : > { %v1480_v11 = vld [vmem:[%s3568_s8 + $0x18] sm:$0xff]  ;;  %v2218_v12 = vpack.c.bf16 %v1478_v9, %v1477_v6  ;;  %v1481_v14 = vld [vmem:[%s3568_s8 + $0x20] sm:$0xff] }
 0x15b   : > { %v2221_v13 = vpack.c.bf16 %v1480_v11, %v1479_v10 }
 0x227   : > { %v878_v16 = vpop.f32.mrb[0].mxu0 }
 0x228   : > { %v879_v17 = vadd.f32 %v2041_v15, %v878_v16  ;;  %v2115_v18 = vpop.f32.mrb[1].mxu0  ;;  %v1482_v15 = vld [vmem:[%s3568_s8 + $0x28] sm:$0xff] }
 0x229   : > { %v2224_v16 = vpack.c.bf16 %v1482_v15, %v1481_v14 }
 0x22a   : > { %vm882_vm3 = vcmp.ge.f32.partialorder %v879_v17, 0.0  ;;  %v883_v19 = vmul.f32 0.01, %v879_v17 }
 0x22c   : > { %v884_v21 = vsel %vm882_vm3, %v879_v17, %v883_v19  ;;  %v1483_v19 = vld [vmem:[%s3568_s8 + $0x30] sm:$0xff] }
 0x22d   : > { %v3316_v22 = vadd.f32 %v885_v20, %v884_v21  ;;  %v1484_v20 = vld [vmem:[%s3568_s8 + $0x38] sm:$0xff] }
 0x22e   : > { %v2227_v21 = vpack.c.bf16 %v1484_v20, %v1483_v19 }
 0x22f   : > { %2125 = vmatmul.mubr.msk.f32.vlgmr.msra.gmra.mrb[0].mxu1 %vm898_vm4, %v3316_v22 }
 0x230   : > { %2141 = vmatprep.mubr.msk.f32.mxu1 %vm2827_vm1, %v2828_v7  ;;  %2213 = vmatpush3.bf16.msra.mxu1 %v2212_v42 }
 0x231   : > { %2149 = vmatprep.subr.mxu1 %v2828_v7 }
 0x302   : > { %v968_v24 = vpop.f32.mrb[0].mxu1 }
 0x303   : > { %v3325_v25 = vadd.f32 %v2043_v23, %v968_v24  ;;  %v2126_v26 = vpop.f32.mrb[1].mxu1  ;;  %v1470_v23 = vld [vmem:[#allocation3] sm:$0xff] }
 0x304   : > { %v1471_v24 = vmul.f32 %v1470_v23, %v1467_v3 }
 0x305   : > { %1072 = vrot.lane.b32.xlu1 %v3325_v25, %s2829_s28  ;;  %981 = vrot.lane.b32.xlu0 %v3325_v25, %s2830_s30 }
 0x309   : > { %1226 = vrot.lane.b32.xlu1 %v3325_v25, %s2831_s1 }
 0x377   : > { %v982_v27 = vpop.permute.xlu0 %981  ;;  %v1073_v28 = vpop.permute.xlu1 %1072 }
 0x378   : > { %2128 = vmatpush3.xpose.msk.msra.mxu0 %vm808_vm2, %v982_v27 }
 0x379   : > { %2132 = vmatprep.subr.mxu0 %v2828_v7 }
 0x37b   : > { %2130 = vmatmul.mubr.msk.f32.vlgmr.msra.gmra.mrb[2].mxu0 %vm808_vm2, %v3325_v25  ;;  %v1227_v43 = vpop.permute.xlu1 %1226 }
 0x37c   : > { %2133 = vmatpush3.msra.mxu0 %v1073_v28  ;;  %2134 = vmatprep.mubr.msk.f32.mxu0 %vm2827_vm1, %v2828_v7 }
 0x37d   : > { %2144 = vmatprep.subr.mxu0 %v2828_v7 }
 0x44e   : > { %v1053_v29 = vpop.f32.mrb[2].mxu0 }
 0x44f   : > { %v1057_v31 = vmul.f32 0.25, %v1053_v29  ;;  %v2131_v32 = vpop.f32.mrb[3].mxu0 }
 0x450   : > { %v2054_v32 = vld [vmem:[#allocation17] ss:$0 sm:$0xff] }
 0x451   : > { %v1059_v33 = vadd.f32 %v1058_v30, %v1057_v31 }
 0x453   : > { %v1061_v34 = vsel %vm1060_vm5, %v1059_v33, -inf }
 0x454   : > { %1062 = vmax.xlane.f32.xlu0 %v1061_v34 }
 0x4e1   : > { %v1063_v35 = vpop.xlane.xlu0 %1062 }
 0x4e2   : > { %v1064_v36 = vsub.f32 %v1059_v33, %v1063_v35 }
 0x4e4   : > { %v1065_v37 = vmul.f32 1.442695, %v1064_v36 }
 0x4e6   : > { %2394 = vpow2.f32 %v1065_v37 }
 0x4f0   : > { %v2395_v38 = vpop.eup %2394 }
 0x4f1   : > { %v1067_v39 = vsel %vm1060_vm5, %v2395_v38, 0.0 }
 0x4f2   : > { %1068 = vadd.xlane.f32.xlu1 %v1067_v39 }
 0x503   : > { %1224 = vrot.lane.b32.xlu1 %v3325_v25, %s2832_s5 }
 0x57f   : > { %v1069_v44 = vpop.xlane.xlu1 %1068 }
 0x580   : > { %2396 = vrcp.f32 %v1069_v44 }
 0x583   : > { %v1225_v47 = vpop.permute.xlu1 %1224 }
 0x58a   : > { %v2397_v45 = vpop.eup %2396 }
 0x58b   : > { %v1071_v46 = vmul.f32 %v2397_v45, %v2395_v38 }
 0x58d   : > { %2135 = vmatmul.mubr.msk.f32.vlgmr.msra.gmra.mrb[4].mxu0 %vm1060_vm5, %v1071_v46 }
 0x58e   : > { %2145 = vmatpush3.xpose.msk.msra.mxu0 %vm808_vm2, %v1227_v43  ;;  %2146 = vmatprep.mubr.msk.f32.mxu0 %vm2827_vm1, %v2828_v7 }
 0x58f   : > { %2217 = vmatprep.subr.bf16.mxu0 %v2826_v5 }
 0x591   : > { %2147 = vmatmul.mubr.msk.f32.vlgmr.msra.gmra.mrb[6].mxu0 %vm808_vm2, %v1225_v47 }
 0x592   : > { %2177 = vmatprep.mubr.msk.f32.mxu0 %vm2827_vm1, %v2828_v7  ;;  %2219 = vmatpush3.bf16.msra.mxu0 %v2218_v12 }
 0x593   : > { %2220 = vmatprep.subr.bf16.mxu0 %v2826_v5 }
 0x596   : > { %2222 = vmatpush3.bf16.msra.mxu0 %v2221_v13 }
 0x597   : > { %2223 = vmatprep.subr.bf16.mxu0 %v2826_v5 }
 0x59a   : > { %2225 = vmatpush3.bf16.msra.mxu0 %v2224_v16 }
 0x59b   : > { %2226 = vmatprep.subr.bf16.mxu0 %v2826_v5 }
 0x59e   : > { %2228 = vmatpush3.bf16.msra.mxu0 %v2227_v21 }
 0x660   : > { %v1144_v48 = vpop.f32.mrb[4].mxu0 }
 0x661   : > { %v2136_v49 = vpop.f32.mrb[5].mxu0  ;;  %2142 = vmatmul.mubr.msk.f32.vlgmr.msra.gmra.mrb[2].mxu1 %vm808_vm2, %v1144_v48 }
 0x662   : > { %2151 = vmatprep.mubr.msk.f32.mxu1 %vm2827_vm1, %v2828_v7 }
 0x664   : > { %v1298_v50 = vpop.f32.mrb[6].mxu0 }
 0x665   : > { %v1302_v51 = vmul.f32 0.25, %v1298_v50  ;;  %v2148_v52 = vpop.f32.mrb[7].mxu0 }
 0x667   : > { %v1303_v53 = vadd.f32 %v1302_v51, %v1058_v30 }
 0x669   : > { %v1304_v54 = vsel %vm1060_vm5, %v1303_v53, -inf }
 0x66a   : > { %1305 = vmax.xlane.f32.xlu1 %v1304_v54 }
 0x67b   : > { %1574 = vrot.lane.b32.xlu1 %v1471_v24, %s2834_s6 }
 0x6f7   : > { %v1306_v55 = vpop.xlane.xlu1 %1305 }
 0x6f8   : > { %v1307_v56 = vsub.f32 %v1303_v53, %v1306_v55 }
 0x6fa   : > { %v1308_v57 = vmul.f32 1.442695, %v1307_v56 }
 0x6fb   : > { %v1575_v42 = vpop.permute.xlu1 %1574 }
 0x6fc   : > { %2398 = vpow2.f32 %v1308_v57 }
 0x706   : > { %v2399_v58 = vpop.eup %2398 }
 0x707   : > { %v1310_v59 = vsel %vm1060_vm5, %v2399_v58, 0.0 }
 0x708   : > { %1311 = vadd.xlane.f32.xlu0 %v1310_v59 }
 0x71e   : > { %1315 = vrot.lane.b32.xlu0 %v3325_v25, %s2833_s23  ;;  %v2045_v25 = vld [vmem:[#allocation16] ss:$0 sm:$0xff] }
 0x71f   : > { %v979_v26 = vadd.f32 %v2045_v25, %v3316_v22 }
 0x722   : > { %1473 = vrot.lane.b32.xlu0 %v1469_v8, %s2834_s6 }
 0x795   : > { %v1312_v60 = vpop.xlane.xlu0 %1311 }
 0x796   : > { %2400 = vrcp.f32 %v1312_v60 }
 0x799   : > { %v1316_v61 = vpop.permute.xlu0 %1315 }
 0x79a   : > { %2150 = vmatpush3.msra.mxu1 %v1316_v61 }
 0x79b   : > { %2214 = vmatprep.subr.bf16.mxu1 %v2826_v5 }
 0x79d   : > { %v1474_v28 = vpop.permute.xlu0 %1473 }
 0x7a0   : > { %v2401_v0 = vpop.eup %2400 }
 0x7a1   : > { %v1314_v2 = vmul.f32 %v2401_v0, %v2399_v58 }
 0x7a3   : > { %2152 = vmatmul.mubr.msk.f32.vlgmr.msra.gmra.mrb[4].mxu1 %vm1060_vm5, %v1314_v2 }
 0x7a4   : > { %2216 = vmatpush3.bf16.msra.mxu1 %v2215_v1  ;;  %2158 = vmatprep.mubr.msk.f32.mxu1 %vm2827_vm1, %v2828_v7 }
 0x876   : > { %v1387_v17 = vpop.f32.mrb[4].mxu1 }
 0x877   : > { %v2153_v18 = vpop.f32.mrb[5].mxu1  ;;  %2159 = vmatmul.mubr.msk.f32.vlgmr.msra.gmra.mrb[2].mxu1 %vm808_vm2, %v1387_v17 }
 0x94a   : > { %v1462_v27 = vpop.f32.mrb[2].mxu1 }
 0x94b   : > { %v2241_v29 = vadd.f32 %v1462_v27, %v979_v26  ;;  %v2160_v30 = vpop.f32.mrb[3].mxu1 }
 0x94d   : > { %v1476_v31 = vsel %vm898_vm4, %v2241_v29, %v1474_v28 }
 0x94e   : > { %2178 = vmatmul.mubr.msk.f32.vlgmr.msra.gmra.mrb[8].mxu0 %vm1492_vm6, %v1476_v31 }
 0xa21   : > { %v1562_v33 = vpop.f32.mrb[8].mxu0 }
 0xa22   : > { %v1563_v34 = vadd.f32 %v2054_v32, %v1562_v33  ;;  %v2179_v35 = vpop.f32.mrb[9].mxu0 }
 0xa24   : > { %2402 = vtanh.f32 %v1563_v34  ;;  %v2056_v37 = vmul.f32 -1.442695, %v1563_v34 }
 0xa26   : > { %2404 = vpow2.f32 %v2056_v37 }
 0xa2e   : > { %v2403_v36 = vpop.eup %2402 }
 0xa2f   : > { %1579 = vrot.lane.b32.xlu0 %v2403_v36, %s2829_s28 }
 0xa30   : > { %v2405_v38 = vpop.eup %2404 }
 0xa31   : > { %v1569_v22 = vadd.f32 1.0, %v2405_v38 }
 0xa33   : > { %2406 = vrcp.f32 %v1569_v22 }
 0xa3d   : > { %v2407_v39 = vpop.eup %2406 }
 0xa3e   : > { %v1577_v43 = vmul.f32 %v2407_v39, %v1575_v42 }
 0xaa1   : > { %v1580_v40 = vpop.permute.xlu0 %1579 }
 0xaa2   : > { %v1582_v41 = vmul.f32 %v2407_v39, %v1580_v40 }
 0xaa4   : > { %1584 = vrot.lane.b32.xlu0 %v1582_v41, %s2834_s6 }
 0xb16   : > { %v1585_v44 = vpop.permute.xlu0 %1584 }
 0xb17   : > { %v1587_v45 = vadd.f32 %v1585_v44, %v1577_v43 }
 0xb19   : > { %2408 = vtanh.f32 %v1587_v45 }
 0xb23   : > { %v2409_v46 = vpop.eup %2408 }
 0xb24   : > { %1590 = vrot.lane.b32.xlu0 %v2409_v46, %s2829_s28 }
 0xb96   : > { %v1591_v47 = vpop.permute.xlu0 %1590 }
 0xb97   : > { %v1593_v48 = vmul.f32 %v2407_v39, %v1591_v47 }
 0xb99   : > { %1595 = vrot.lane.b32.xlu0 %v1593_v48, %s2834_s6 }
 0xb9d   : > { %1600 = vrot.lane.b32.xlu0 %v1587_v45, %s2830_s30 }
 0xc0a   : > { %1607 = sbr.rel (%p2057_p3) target bundleno = 3089 (0xc11), region = 140 }
 0xc0b   : > { %v1596_v49 = vpop.permute.xlu0 %1595 }
 0xc0c   : > { %1598 = vst.msk [vmem:[#allocation2] sm:$0xff] %vm898_vm4, %v1596_v49  ;;  %1608 = vst.msk [vmem:[#allocation22] sm:$0xff] (!%p2057_p3), %vm898_vm4, %v1596_v49 }
 0xc0f   : > { %v1601_v50 = vpop.permute.xlu0 %1600 }
 0xc10   : > { %1603 = vst.msk [vmem:[#allocation3] sm:$0xff] %vm898_vm4, %v1601_v50  ;;  %1609 = vst.msk [vmem:[#allocation23] sm:$0xff] (!%p2057_p3), %vm898_vm4, %v1601_v50 }
 0xc11 PF: > { %vm1610_vm7 = vcmask 1044224   ;;  %vm1618_vm8 = vcmask 1048324   ;;  %2229 = vmatprep.subr.bf16.mxu1 %v2826_v5  ;;  %v1628_v51 = vld [vmem:[#allocation20] sm:$0xff]  ;;  %v1629_v52 = vld [vmem:[#allocation20 + $0x8] sm:$0xff]  ;;  %v1630_v53 = vld [vmem:[#allocation20 + $0x10] sm:$0xff]  ;;  %2188 = vmatprep.mubr.msk.f32.mxu1 %vm2827_vm1, %v2828_v7  ;;  %vm1626_vm9 = vcmask 1040384  }
 0xc12   : > { %v1611_v54 = vsel %vm1610_vm7, %v1593_v48, -inf  ;;  %v1619_v55 = vsel %vm1618_vm8, %v1593_v48, -inf  ;;  %v2230_v56 = vpack.c.bf16 %v1629_v52, %v1628_v51  ;;  %v1631_v57 = vld [vmem:[#allocation20 + $0x18] sm:$0xff]  ;;  %s3569_s25 = sld [smem:[#allocation46_spill]]  ;;  %s3571_s1 = sld [smem:[#allocation45_spill]] }
 0xc13   : > { %v1612_v58 = vrot.slane %v1611_v54, 4  ;;  %v1620_v59 = vrot.slane %v1619_v55, 4  ;;  %v2233_v60 = vpack.c.bf16 %v1631_v57, %v1630_v53  ;;  %p2337_p13 = scmp.eq.s32.totalorder %s2966_s26, 3  ;;  %s2835_s5 = smov [#allocation22]  }
 0xc14   : > { %2231 = vmatpush3.bf16.msra.mxu1 %v2230_v56  ;;  %s1817_s23 = sshll.u32 %s2835_s5, 4  ;;  %s2836_s10 = smov [#allocation23]   ;;  %s1818_s23 = int_to_ptr.vmem [resolvable:$true] %s1817_s23 }
 0xc15   : > { %v1613_v61 = vmax.f32 %v1611_v54, %v1612_v58  ;;  %v1621_v62 = vmax.f32 %v1619_v55, %v1620_v59  ;;  %2232 = vmatprep.subr.bf16.mxu1 %v2826_v5  ;;  %s1828_s15 = sshll.u32 %s2836_s10, 4  ;;  %s2694_s28 = scalar_lea.vmem %s1818_s23, 128  ;;  %s1829_s15 = int_to_ptr.vmem [resolvable:$true] %s1828_s15 }
 0xc16   : > { %p2695_p11 = scmp.ne.s32.totalorder %s1818_s23, %s2694_s28  ;;  %p2701_p12 = scmp.lt.s32.totalorder %s1818_s23, %s1818_s23 }
 0xc17   : > { %v1614_v63 = vrot.slane %v1613_v61, 2  ;;  %v1622_v0 = vrot.slane %v1621_v62, 2  ;;  %p2702_p0 = scmp.lt.s32.totalorder %s2694_s28, %s2694_s28 }
 0xc18   : > { %2234 = vmatpush3.bf16.msra.mxu1 %v2233_v60  ;;  %s3570_s7 = smov %s3569_s25  ;;  %v1717_v10 = vld [vmem:[%s3569_s25] sm:$0xff]  ;;  %p2696_p6 = pnand %p2695_p11, %p2337_p13 }
 0xc19   : > { %v1615_v1 = vmax.f32 %v1613_v61, %v1614_v63  ;;  %v1623_v2 = vmax.f32 %v1621_v62, %v1622_v0  ;;  %2235 = vmatprep.subr.bf16.mxu1 %v2826_v5  ;;  %v1718_v11 = vld [vmem:[%s3570_s7 + $0x8] sm:$0xff]  ;;  %v1719_v14 = vld [vmem:[%s3570_s7 + $0x10] sm:$0xff]  ;;  %v1720_v15 = vld [vmem:[%s3570_s7 + $0x18] sm:$0xff]  ;;  %p2703_p5 = por %p2702_p0, %p2701_p12 }
 0xc1a   : > { %v2236_v12 = vpack.c.bf16 %v1718_v11, %v1717_v10  ;;  %v2239_v16 = vpack.c.bf16 %v1720_v15, %v1719_v14  ;;  %v2058_v17 = vld [vmem:[%s3571_s1] ss:$0 sm:$0xff]  ;;  %p2697_p10 = pneg %p2696_p6 }
 0xc1b   : > { %v1616_v3 = vrot.slane %v1615_v1, 1  ;;  %v1624_v4 = vrot.slane %v1623_v2, 1 }
 0xc1c   : > { %p2704_p8 = pnand %p2703_p5, %p2697_p10 }
 0xc1d   : > { %v1617_v6 = vmax.f32 %v1615_v1, %v1616_v3  ;;  %v1625_v8 = vmax.f32 %v1623_v2, %v1624_v4 }
 0xc1f   : > { %v1627_v9 = vsel %vm1626_vm9, %v1617_v6, %v1625_v8 }
 0xc20   : > { %1640 = vrot.lane.b32.xlu0 %v1627_v9, %s2834_s6 }
 0xc92   : > { %v1641_v13 = vpop.permute.xlu0 %1640 }
 0xc93   : > { %2189 = vmatmul.mubr.msk.f32.vlgmr.msra.gmra.mrb[6].mxu1 %vm898_vm4, %v1641_v13 }
 0xc94   : > { %2237 = vmatpush3.bf16.msra.mxu1 %v2236_v12  ;;  %2199 = vmatprep.mubr.msk.f32.mxu1 %vm2827_vm1, %v2828_v7 }
 0xc95   : > { %2238 = vmatprep.subr.bf16.mxu1 %v2826_v5 }
 0xc98   : > { %2240 = vmatpush3.bf16.msra.mxu1 %v2239_v16 }
 0xd66   : > { %v1710_v18 = vpop.f32.mrb[6].mxu1 }
 0xd67   : > { %v1711_v19 = vadd.f32 %v2058_v17, %v1710_v18  ;;  %v2190_v7 = vpop.f32.mrb[7].mxu1 }
 0xd69   : > { %vm1714_vm10 = vcmp.ge.f32.partialorder %v1711_v19, 0.0  ;;  %v1715_v5 = vmul.f32 0.01, %v1711_v19 }
 0xd6b   : > { %v1716_v20 = vsel %vm1714_vm10, %v1711_v19, %v1715_v5 }
 0xd6c   : > { %2200 = vmatmul.mubr.msk.f32.vlgmr.msra.gmra.mrb[8].mxu1 %vm898_vm4, %v1716_v20 }
 0xd6d   : > { %2707 = shalt.err (!%p2704_p8)
}
 0xd6e   : > { %s3572_s22 = sld [smem:[#allocation47_spill]] }
 0xd74   : > { %s2708_s0 = scalar_lea.hbm %s3572_s22, 128 }
 0xd75   : > { %p2709_p7 = scmp.ne.s32.totalorder %s3572_s22, %s2708_s0  ;;  %p2714_p1 = scmp.lt.u32.totalorder %s2708_s0, %s3572_s22 }
 0xd77   : > { %p2710_p2 = pnand %p2709_p7, %p2337_p13 }
 0xd79   : > { %p2711_p9 = pneg %p2710_p2 }
 0xd7b   : > { %p2716_p4 = pnand %p2714_p1, %p2711_p9 }
 0xd7d   : > { %2719 = shalt.err (!%p2716_p4)
}
 0xd7e   : > { %2281 = dma.vmem_to_hbm [thread:$0]  (%p2337_p13), %s1818_s23, 128, %s3572_s22, [#allocation7]  }
 0xd7f   : > { %s2720_s1 = scalar_lea.vmem %s1829_s15, 128  ;;  %p2727_p10 = scmp.lt.s32.totalorder %s1829_s15, %s1829_s15 }
 0xd80   : > { %p2721_p3 = scmp.ne.s32.totalorder %s1829_s15, %s2720_s1  ;;  %p2728_p12 = scmp.lt.s32.totalorder %s2720_s1, %s2720_s1 }
 0xd82   : > { %p2722_p11 = pnand %p2721_p3, %p2337_p13  ;;  %p2729_p0 = por %p2728_p12, %p2727_p10 }
 0xd84   : > { %p2723_p6 = pneg %p2722_p11 }
 0xd86   : > { %p2730_p5 = pnand %p2729_p0, %p2723_p6 }
 0xd88   : > { %2733 = shalt.err (!%p2730_p5)
}
 0xd89   : > { %s3573_s28 = sld [smem:[#allocation48_spill]] }
 0xd8f   : > { %s2734_s30 = scalar_lea.hbm %s3573_s28, 128 }
 0xd90   : > { %p2735_p8 = scmp.ne.s32.totalorder %s3573_s28, %s2734_s30  ;;  %p2740_p9 = scmp.lt.u32.totalorder %s2734_s30, %s3573_s28 }
 0xd92   : > { %p2736_p7 = pnand %p2735_p8, %p2337_p13 }
 0xd94   : > { %p2737_p2 = pneg %p2736_p7 }
 0xd96   : > { %p2742_p1 = pnand %p2740_p9, %p2737_p2 }
 0xd98   : > { %2745 = shalt.err (!%p2742_p1)
}
 0xd99   : > { %2283 = dma.vmem_to_hbm [thread:$0]  (%p2337_p13), %s1829_s15, 128, %s3573_s28, [#allocation24]   ;;  %v2060_v21 = vld [vmem:[#allocation4] ss:$0 sm:$0xff]  ;;  %vm1801_vm11 = vcmask 1024  }
 0xe3f   : > { %v1797_v23 = vpop.f32.mrb[8].mxu1 }
 0xe40   : > { %v1798_v24 = vadd.f32 %v2060_v21, %v1797_v23  ;;  %v2201_v25 = vpop.f32.mrb[9].mxu1 }
 0xe42   : > { %1802 = vst.msk [vmem:[%s3289_s21] sm:$0x3] %vm1801_vm11, %v1798_v24 }
 0xe43   : > { %2791 = dma.done.wait (%p2337_p13), [#allocation7], 128  }
 0xe44   : > { %2793 = vsyncadd (%p2337_p13), [#allocation7], 4294967168 }
 0xe45   : > { %2795 = dma.done.wait (%p2337_p13), [#allocation24], 128  }
 0xe46   : > { %2797 = vsyncadd (%p2337_p13), [#allocation24], 4294967168 }
 0xe47 PF: > { %p42_p4 = scmp.ge.s32.totalorder %s3161_s29, 6   ;;  %s3574_s23 = smov %s2804_s24 }
 0xe48   : > { %s3575_s24 = smov %s2808_s2  ;;  %s3576_s2 = smov %s3173_s17 }
 0xe49   : > { %s3577_s25 = smov %s3161_s29  ;;  %44 = sbr.rel (!%p42_p4) target bundleno = 27 (0x1b), region = 202 }
 0xe50   :  { %1852 = vsyncpa [#allocation6], 1 }
 0xe51   :  { %1854 = vsyncpa [#allocation6 + $0x1], 1 }
 0xe52   :  { %1855 = vsyncpa [#allocation9], 1 }
 0xe53   :  { %1857 = vsyncpa [#allocation9 + $0x1], 1 }
 0xe54   :  { %1858 = vsyncpa [#allocation12], 1 }
 0xe55   :  { %1859 = vsyncpa [#allocation15], 1 }
 0xe56   :  { %1860 = vsyncpa [#allocation18], 1 }
 0xe57   :  { %1861 = vsyncpa [#allocation21], 1 }
 0xe58   :  { %1862 = vsyncpa [#allocation7], 1 }
 0xe59   :  { %1864 = vsyncpa [#allocation7 + $0x1], 1 }
 0xe5a   :  { %1865 = vsyncpa [#allocation24], 1 }

</bundles_post_ra>
